<compile_context>
chip_gen: v7x
topology: tpu7x:2x2x1
jax: 0.10.0
libtpu: 0.0.40
codegen_flags: <defaults>
</compile_context>

<pallas_src>
import functools

import jax
import jax.numpy as jnp
from jax import lax
from jax.experimental import pallas as pl
from jax.experimental.pallas import tpu as pltpu

EPS = 1e-5
LANES = 128
SUBLANE = 16                       # covers f32 (8) and bf16 (16) sublane tiling

MATMUL_DTYPE = jnp.bfloat16        # MXU operand dtype (accumulation stays f32)
ACT_DTYPE = jnp.bfloat16           # HBM dtype of the h1 / h2 intermediates


def _round_up(x, m):
    return (x + m - 1) // m * m


def _pick_l_tile(L, max_tile=512):
    """Tile the L axis into ~max_tile-row, sublane-aligned tiles (L gets padded)."""
    n_tiles = -(-L // max_tile)
    return _round_up(-(-L // n_tiles), SUBLANE)


# --------------------------------------------------------------------------
# In-kernel helpers
# --------------------------------------------------------------------------
def _conv3(x, lo, hi, w_ref, tl):
    """3-tap conv along rows: y[l] = x[l-1]@W0 + x[l]@W1 + x[l+1]@W2.

    x: (TL, Cp) f32 tile; lo/hi: (1, Cp) f32 halo rows (zero at sequence edges);
    w_ref: (3, Cp, Cp) bf16 tap matrices.  Returns f32 (TL, Cp) accumulator.
    """
    md = MATMUL_DTYPE
    x_prev = jnp.concatenate([lo, x[:tl - 1, :]], axis=0)   # x[l-1]
    x_next = jnp.concatenate([x[1:, :], hi], axis=0)        # x[l+1]
    acc = jnp.dot(x_prev.astype(md), w_ref[0], preferred_element_type=jnp.float32)
    acc = acc + jnp.dot(x.astype(md), w_ref[1], preferred_element_type=jnp.float32)
    acc = acc + jnp.dot(x_next.astype(md), w_ref[2], preferred_element_type=jnp.float32)
    return acc


def _partial_stats(src):
    """(sum, sum-of-squares) over the tile rows -> (2, Cp), from the f32 acc."""
    s = jnp.sum(src, axis=0, keepdims=True)
    sq = jnp.sum(src * src, axis=0, keepdims=True)
    return jnp.concatenate([s, sq], axis=0)


def _row_valid(tl, l_real):
    row = pl.program_id(1) * tl + lax.broadcasted_iota(jnp.int32, (tl, 1), 0)
    return row < l_real


# --------------------------------------------------------------------------
# Pass 1: conv1 (bias absorbed by BN), emit per-tile BN1 partial stats
# --------------------------------------------------------------------------
def _conv1_kernel(x_ref, halo_ref, w_ref, h_ref, stat_ref, *, tl, l_real, mask_tail):
    x = x_ref[0]                                   # (TL, Cp) f32
    halo = halo_ref[0]                             # (2, Cp) f32: [0]=lo, [1]=hi
    acc = _conv3(x, halo[0:1, :], halo[1:2, :], w_ref, tl)
    src = acc
    if mask_tail:                                  # exclude padded rows from stats
        src = jnp.where(_row_valid(tl, l_real), acc, 0.0)
    stat_ref[0] = _partial_stats(src)
    h_ref[0] = acc.astype(h_ref.dtype)             # bf16 store (stats used f32 acc)


# --------------------------------------------------------------------------
# Pass 2: bn1 (folded FMA) + relu + conv2, emit per-tile BN2 partial stats
# --------------------------------------------------------------------------
def _bn_relu_conv2_kernel(h1_ref, halo_ref, sc_ref, sh_ref, w_ref, h2_ref, stat_ref,
                          *, tl, l_real, mask_tail):
    a = jnp.maximum(h1_ref[0].astype(jnp.float32) * sc_ref[...] + sh_ref[...], 0.0)
    if mask_tail:
        valid = _row_valid(tl, l_real)
        a = jnp.where(valid, a, 0.0)               # conv2 zero-padding at the true L edge
    halo = halo_ref[0]                             # halo rows arrive pre-activated
    acc = _conv3(a, halo[0:1, :], halo[1:2, :], w_ref, tl)
    src = acc
    if mask_tail:
        src = jnp.where(valid, acc, 0.0)
    stat_ref[0] = _partial_stats(src)
    h2_ref[0] = acc.astype(h2_ref.dtype)


# --------------------------------------------------------------------------
# Pass 3: bn2 (folded FMA) + residual add + relu (single lane-dense f32 store)
# --------------------------------------------------------------------------
def _bn_add_relu_kernel(h2_ref, x_ref, sc_ref, sh_ref, o_ref):
    y = h2_ref[0].astype(jnp.float32) * sc_ref[...] + sh_ref[...] + x_ref[0]
    o_ref[0] = jnp.maximum(y, 0.0).astype(o_ref.dtype)


# --------------------------------------------------------------------------
# Wrapper-side glue (tiny (C,)-sized math and halo-row gathers between passes)
# --------------------------------------------------------------------------
def _make_halos(a, tl, nt):
    """(N, nt*tl, C) -> merged halos (N*nt, 2, C) f32; zeros at sequence edges."""
    n, lp, c = a.shape
    a32 = a.astype(jnp.float32)
    zero = jnp.zeros((n, 1, c), jnp.float32)
    lo = jnp.concatenate([zero, a32[:, tl - 1:lp - 1:tl, :]], axis=1)   # row i*tl-1
    hi = jnp.concatenate([a32[:, tl::tl, :], zero], axis=1)            # row (i+1)*tl
    return jnp.stack([lo, hi], axis=2).reshape(n * nt, 2, c)


def _make_act_halos(h1, tl, nt, scale, shift):
    """Same as _make_halos but applies bn1-FMA + relu to the interior halo rows."""
    n, lp, c = h1.shape
    lo_rows = h1[:, tl - 1:lp - 1:tl, :].astype(jnp.float32)
    hi_rows = h1[:, tl::tl, :].astype(jnp.float32)
    lo_a = jnp.maximum(lo_rows * scale[None] + shift[None], 0.0)
    hi_a = jnp.maximum(hi_rows * scale[None] + shift[None], 0.0)
    zero = jnp.zeros((n, 1, c), jnp.float32)
    lo = jnp.concatenate([zero, lo_a], axis=1)
    hi = jnp.concatenate([hi_a, zero], axis=1)
    return jnp.stack([lo, hi], axis=2).reshape(n * nt, 2, c)


def _fold_bn(partial_stats, count, gamma, beta):
    """(N*nT, 2, C) per-tile (sum, sumsq) -> per-channel (scale, shift), (1, C)."""
    # TODO(synk): for very large N*L, switch to mean-centered partials to avoid
    # E[x^2]-mean^2 cancellation in f32.
    s = jnp.sum(partial_stats, axis=0)                     # (2, C)
    mean = s[0] / count
    var = jnp.maximum(s[1] / count - mean * mean, 0.0)     # biased var (training BN)
    scale = gamma * lax.rsqrt(var + EPS)
    shift = beta - mean * scale
    return scale[None, :], shift[None, :]


# --------------------------------------------------------------------------
# Public entry point (PyTorch (N, C, L) layout in/out)
# --------------------------------------------------------------------------
def basic_block_pallas(x_ncl, params, *, max_l_tile=512):
    # Conv biases are intentionally ignored: a per-channel constant added before
    # training-mode BatchNorm is exactly absorbed by the mean subtraction.
    w1, _b1, g1, be1, w2, _b2, g2, be2 = params
    N, C, L = x_ncl.shape
    Cout, Cin, K = w1.shape
    # stride=1, downsample=None (default BasicBlock) => inplanes == planes.
    assert K == 3 and Cin == C and Cout == C

    f32 = jnp.float32
    Cp = _round_up(C, LANES)
    TL = _pick_l_tile(L, max_l_tile)
    Lp = _round_up(L, TL)
    nT = Lp // TL
    mask_tail = (Lp != L)

    # NCL -> NLC; zero-pad channels to a lane multiple and L to a tile multiple.
    # Padded channels carry zero weights/gamma/beta so they stay exactly 0.
    # TODO(synk): when chaining blocks, keep activations in padded NLC between
    # blocks so this transpose/pad happens once per network.
    x = jnp.transpose(x_ncl, (0, 2, 1)).astype(f32)
    x = jnp.pad(x, ((0, 0), (0, Lp - L), (0, Cp - C)))

    def pad_w(w):   # (Cout, Cin, 3) -> tap-major, channel-padded (3, Cp, Cp) bf16
        wt = jnp.transpose(w, (2, 1, 0)).astype(f32)
        return jnp.zeros((3, Cp, Cp), f32).at[:, :Cin, :Cout].set(wt).astype(MATMUL_DTYPE)

    def pad_v(v):   # (C,) -> (Cp,), zero padded, f32
        return jnp.zeros((Cp,), f32).at[:C].set(v.astype(f32))

    w1p, w2p = pad_w(w1), pad_w(w2)
    g1p, be1p = pad_v(g1), pad_v(be1)
    g2p, be2p = pad_v(g2), pad_v(be2)

    # Per-step VMEM footprint (double-buffered) is tiny; set an explicit scoped
    # limit with headroom, kept well under v7x's 64 MiB physical VMEM.
    per_step = (2 * TL * Cp * 4          # f32 tile in + f32 tile out (worst pass)
                + 2 * TL * Cp * 2        # bf16 tile in/out
                + 3 * Cp * Cp * 2        # weights
                + 8 * Cp * 4)            # halos / stats / scale / shift
    vmem_limit = int(min(max(3 * 2 * per_step, 16 * 1024 * 1024), 48 * 1024 * 1024))

    grid = (N, nT)
    par = pltpu.CompilerParams(
        dimension_semantics=("parallel", "parallel"),
        vmem_limit_bytes=vmem_limit,
    )

    tile_spec = pl.BlockSpec((1, TL, Cp), lambda n, i: (n, i, 0))
    halo_spec = pl.BlockSpec((1, 2, Cp), lambda n, i: (n * nT + i, 0, 0))
    w_spec = pl.BlockSpec((3, Cp, Cp), lambda n, i: (0, 0, 0))
    vec_spec = pl.BlockSpec((1, Cp), lambda n, i: (0, 0))
    stat_spec = pl.BlockSpec((1, 2, Cp), lambda n, i: (n * nT + i, 0, 0))

    h_shape = jax.ShapeDtypeStruct((N, Lp, Cp), ACT_DTYPE)
    stat_shape = jax.ShapeDtypeStruct((N * nT, 2, Cp), f32)
    out_f32_shape = jax.ShapeDtypeStruct((N, Lp, Cp), f32)

    # ---- pass 1: conv1 + BN1 partial stats ---------------------------------
    halos_x = _make_halos(x, TL, nT)
    h1, pstats1 = pl.pallas_call(
        functools.partial(_conv1_kernel, tl=TL, l_real=L, mask_tail=mask_tail),
        grid=grid,
        in_specs=[tile_spec, halo_spec, w_spec],
        out_specs=[tile_spec, stat_spec],
        out_shape=[h_shape, stat_shape],
        compiler_params=par,
    )(x, halos_x, w1p)

    scale1, shift1 = _fold_bn(pstats1, N * L, g1p, be1p)

    # conv2's halo rows must be post-(bn1+relu); sequence-edge halos stay zero.
    halos_a = _make_act_halos(h1, TL, nT, scale1, shift1)

    # ---- pass 2: bn1 + relu + conv2 + BN2 partial stats ---------------------
    h2, pstats2 = pl.pallas_call(
        functools.partial(_bn_relu_conv2_kernel, tl=TL, l_real=L, mask_tail=mask_tail),
        grid=grid,
        in_specs=[tile_spec, halo_spec, vec_spec, vec_spec, w_spec],
        out_specs=[tile_spec, stat_spec],
        out_shape=[h_shape, stat_shape],
        compiler_params=par,
    )(h1, halos_a, scale1, shift1, w2p)

    scale2, shift2 = _fold_bn(pstats2, N * L, g2p, be2p)

    # ---- pass 3: bn2 + residual add + relu ----------------------------------
    out = pl.pallas_call(
        _bn_add_relu_kernel,
        grid=grid,
        in_specs=[tile_spec, tile_spec, vec_spec, vec_spec],
        out_specs=tile_spec,
        out_shape=out_f32_shape,
        compiler_params=par,
    )(h2, x, scale2, shift2)

    # Padded NLC -> NCL, drop L and channel padding.
    return jnp.transpose(out[:, :L, :C], (0, 2, 1))


# --------------------------------------------------------------------------
# Pure-JAX reference mirroring the PyTorch forward (training-mode BN)
# --------------------------------------------------------------------------
def basic_block_reference(x_ncl, params):
    w1, b1, g1, be1, w2, b2, g2, be2 = params

    def conv(x, w, b):
        y = lax.conv_general_dilated(
            x, w, window_strides=(1,), padding="SAME",
            dimension_numbers=("NCH", "OIH", "NCH"))
        return y + b[None, :, None]

    def bn(y, g, be):
        mean = jnp.mean(y, axis=(0, 2), keepdims=True)
        var = jnp.mean((y - mean) ** 2, axis=(0, 2), keepdims=True)
        return (y - mean) / jnp.sqrt(var + EPS) * g[None, :, None] + be[None, :, None]

    out = jnp.maximum(bn(conv(x_ncl, w1, b1), g1, be1), 0.0)
    out = bn(conv(out, w2, b2), g2, be2) + x_ncl
    return jnp.maximum(out, 0.0)


def make_params(key, inplanes, planes):
    ks = jax.random.split(key, 8)
    w1 = 0.1 * jax.random.normal(ks[0], (planes, inplanes, 3), jnp.float32)
    b1 = 0.05 * jax.random.normal(ks[1], (planes,), jnp.float32)
    w2 = 0.1 * jax.random.normal(ks[2], (planes, planes, 3), jnp.float32)
    b2 = 0.05 * jax.random.normal(ks[3], (planes,), jnp.float32)
    g1 = 1.0 + 0.1 * jax.random.normal(ks[4], (planes,), jnp.float32)
    be1 = 0.1 * jax.random.normal(ks[5], (planes,), jnp.float32)
    g2 = 1.0 + 0.1 * jax.random.normal(ks[6], (planes,), jnp.float32)
    be2 = 0.1 * jax.random.normal(ks[7], (planes,), jnp.float32)
    return (w1, b1, g1, be1, w2, b2, g2, be2)


if __name__ == "__main__":
    key = jax.random.PRNGKey(0)
    kx, kp = jax.random.split(key)

    # inplanes = planes = 64, stride = 1, no downsample.
    N, C = 2, 64
    params = make_params(kp, C, C)

    # bf16 MXU operands -> compare against the f32 reference with a bf16-scale
    # tolerance (outputs are O(1) after BatchNorm).
    TOL = 6e-2

    # Case 1: L fits a single large tile (nT = 1, no tail masking).
    L1 = 256
    x1 = jax.random.normal(kx, (N, C, L1), jnp.float32)
    out1 = jax.block_until_ready(jax.jit(basic_block_pallas)(x1, params))
    ref1 = jax.block_until_ready(basic_block_reference(x1, params))
    assert out1.shape == (N, C, L1)
    assert jnp.max(jnp.abs(out1 - ref1)) < TOL, "Pallas mismatch (L=256)"

    # Case 2: awkward L with multiple tiles -> exercises halos across tiles and
    # the padded-tail masking path.
    L2 = 250
    x2 = jax.random.normal(jax.random.fold_in(kx, 1), (N, C, L2), jnp.float32)
    f2 = jax.jit(functools.partial(basic_block_pallas, max_l_tile=128))
    out2 = jax.block_until_ready(f2(x2, params))
    ref2 = jax.block_until_ready(basic_block_reference(x2, params))
    assert out2.shape == (N, C, L2)
    assert jnp.max(jnp.abs(out2 - ref2)) < TOL, "Pallas mismatch (L=250, tiled)"

    print("KERNEL_OK")
</pallas_src>

<mosaic_0001>
module attributes {stable_mosaic.version = 11 : i64} {
  func.func @_bn_relu_conv2_kernel(%arg0: i32, %arg1: i32, %arg2: memref<1x256x128xbf16, #tpu.memory_space<vmem>>, %arg3: memref<1x2x128xf32, #tpu.memory_space<vmem>>, %arg4: memref<1x128xf32, #tpu.memory_space<vmem>>, %arg5: memref<1x128xf32, #tpu.memory_space<vmem>>, %arg6: memref<3x128x128xbf16, #tpu.memory_space<vmem>>, %arg7: memref<1x256x128xbf16, #tpu.memory_space<vmem>>, %arg8: memref<1x2x128xf32, #tpu.memory_space<vmem>>) attributes {dimension_semantics = [#tpu.dimension_semantics<parallel>, #tpu.dimension_semantics<parallel>], iteration_bounds = array<i64: 2, 1>, scalar_prefetch = 0 : i64, scratch_operands = 0 : i64, tpu.core_type = #tpu.core_type<tc>, window_params = [{transform_indices = @transform_0, window_bounds = array<i64: 1, 256, 128>}, {transform_indices = @transform_1, window_bounds = array<i64: 1, 2, 128>}, {pipeline_mode = #tpu.pipeline_mode<synchronous>, transform_indices = @transform_2, window_bounds = array<i64: 1, 128>}, {pipeline_mode = #tpu.pipeline_mode<synchronous>, transform_indices = @transform_3, window_bounds = array<i64: 1, 128>}, {pipeline_mode = #tpu.pipeline_mode<synchronous>, transform_indices = @transform_4, window_bounds = array<i64: 3, 128, 128>}, {transform_indices = @transform_5, window_bounds = array<i64: 1, 256, 128>}, {transform_indices = @transform_6, window_bounds = array<i64: 1, 2, 128>}]} {
    %c0 = arith.constant 0 : index
    %c0_0 = arith.constant 0 : index
    %c0_1 = arith.constant 0 : index
    %0 = vector.load %arg2[%c0, %c0_0, %c0_1] : memref<1x256x128xbf16, #tpu.memory_space<vmem>>, vector<1x256x128xbf16>
    %1 = vector.shape_cast %0 : vector<1x256x128xbf16> to vector<256x128xbf16>
    %2 = arith.extf %1 : vector<256x128xbf16> to vector<256x128xf32>
    %c0_2 = arith.constant 0 : index
    %c0_3 = arith.constant 0 : index
    %3 = vector.load %arg4[%c0_2, %c0_3] : memref<1x128xf32, #tpu.memory_space<vmem>>, vector<1x128xf32>
    %4 = vector.broadcast %3 : vector<1x128xf32> to vector<256x128xf32>
    %5 = arith.mulf %2, %4 : vector<256x128xf32>
    %c0_4 = arith.constant 0 : index
    %c0_5 = arith.constant 0 : index
    %6 = vector.load %arg5[%c0_4, %c0_5] : memref<1x128xf32, #tpu.memory_space<vmem>>, vector<1x128xf32>
    %7 = vector.broadcast %6 : vector<1x128xf32> to vector<256x128xf32>
    %8 = arith.addf %5, %7 : vector<256x128xf32>
    %cst = arith.constant 0.000000e+00 : f32
    %9 = vector.broadcast %cst : f32 to vector<256x128xf32>
    %10 = arith.maximumf %8, %9 : vector<256x128xf32>
    %c0_6 = arith.constant 0 : index
    %c0_7 = arith.constant 0 : index
    %c0_8 = arith.constant 0 : index
    %11 = vector.load %arg3[%c0_6, %c0_7, %c0_8] : memref<1x2x128xf32, #tpu.memory_space<vmem>>, vector<1x2x128xf32>
    %12 = vector.shape_cast %11 : vector<1x2x128xf32> to vector<2x128xf32>
    %13 = vector.extract_strided_slice %12 {offsets = [0, 0], sizes = [1, 128], strides = [1, 1]} : vector<2x128xf32> to vector<1x128xf32>
    %14 = vector.extract_strided_slice %12 {offsets = [1, 0], sizes = [1, 128], strides = [1, 1]} : vector<2x128xf32> to vector<1x128xf32>
    %15 = vector.extract_strided_slice %10 {offsets = [0, 0], sizes = [255, 128], strides = [1, 1]} : vector<256x128xf32> to vector<255x128xf32>
    %16 = tpu.concatenate %13, %15 in 0 : vector<1x128xf32>, vector<255x128xf32> -> vector<256x128xf32>
    %17 = vector.extract_strided_slice %10 {offsets = [1, 0], sizes = [255, 128], strides = [1, 1]} : vector<256x128xf32> to vector<255x128xf32>
    %18 = tpu.concatenate %17, %14 in 0 : vector<255x128xf32>, vector<1x128xf32> -> vector<256x128xf32>
    %19 = arith.truncf %16 : vector<256x128xf32> to vector<256x128xbf16>
    %c0_9 = arith.constant 0 : index
    %c0_10 = arith.constant 0 : index
    %c0_11 = arith.constant 0 : index
    %20 = vector.load %arg6[%c0_9, %c0_10, %c0_11] : memref<3x128x128xbf16, #tpu.memory_space<vmem>>, vector<1x128x128xbf16>
    %21 = vector.shape_cast %20 : vector<1x128x128xbf16> to vector<128x128xbf16>
    %cst_12 = arith.constant dense<0.000000e+00> : vector<256x128xf32>
    %22 = tpu.matmul %19, %21, %cst_12 {dimension_numbers = #tpu.dot_dimension_numbers<[1], [0], [0], [1], [0, 0, 1, 1], [], []>} : vector<256x128xbf16>, vector<128x128xbf16>, vector<256x128xf32> -> vector<256x128xf32>
    %23 = arith.truncf %10 : vector<256x128xf32> to vector<256x128xbf16>
    %c1 = arith.constant 1 : index
    %c0_13 = arith.constant 0 : index
    %c0_14 = arith.constant 0 : index
    %24 = vector.load %arg6[%c1, %c0_13, %c0_14] : memref<3x128x128xbf16, #tpu.memory_space<vmem>>, vector<1x128x128xbf16>
    %25 = vector.shape_cast %24 : vector<1x128x128xbf16> to vector<128x128xbf16>
    %cst_15 = arith.constant dense<0.000000e+00> : vector<256x128xf32>
    %26 = tpu.matmul %23, %25, %cst_15 {dimension_numbers = #tpu.dot_dimension_numbers<[1], [0], [0], [1], [0, 0, 1, 1], [], []>} : vector<256x128xbf16>, vector<128x128xbf16>, vector<256x128xf32> -> vector<256x128xf32>
    %27 = arith.addf %22, %26 : vector<256x128xf32>
    %28 = arith.truncf %18 : vector<256x128xf32> to vector<256x128xbf16>
    %c2 = arith.constant 2 : index
    %c0_16 = arith.constant 0 : index
    %c0_17 = arith.constant 0 : index
    %29 = vector.load %arg6[%c2, %c0_16, %c0_17] : memref<3x128x128xbf16, #tpu.memory_space<vmem>>, vector<1x128x128xbf16>
    %30 = vector.shape_cast %29 : vector<1x128x128xbf16> to vector<128x128xbf16>
    %cst_18 = arith.constant dense<0.000000e+00> : vector<256x128xf32>
    %31 = tpu.matmul %28, %30, %cst_18 {dimension_numbers = #tpu.dot_dimension_numbers<[1], [0], [0], [1], [0, 0, 1, 1], [], []>} : vector<256x128xbf16>, vector<128x128xbf16>, vector<256x128xf32> -> vector<256x128xf32>
    %32 = arith.addf %27, %31 : vector<256x128xf32>
    %cst_19 = arith.constant dense<0.000000e+00> : vector<128xf32>
    %33 = vector.multi_reduction <add>, %32, %cst_19 [0] : vector<256x128xf32> to vector<128xf32>
    %34 = vector.shape_cast %33 : vector<128xf32> to vector<1x128xf32>
    %35 = arith.mulf %32, %32 : vector<256x128xf32>
    %cst_20 = arith.constant dense<0.000000e+00> : vector<128xf32>
    %36 = vector.multi_reduction <add>, %35, %cst_20 [0] : vector<256x128xf32> to vector<128xf32>
    %37 = vector.shape_cast %36 : vector<128xf32> to vector<1x128xf32>
    %38 = tpu.concatenate %34, %37 in 0 : vector<1x128xf32>, vector<1x128xf32> -> vector<2x128xf32>
    %c0_21 = arith.constant 0 : index
    %c0_22 = arith.constant 0 : index
    %c0_23 = arith.constant 0 : index
    %39 = vector.load %arg8[%c0_21, %c0_22, %c0_23] : memref<1x2x128xf32, #tpu.memory_space<vmem>>, vector<1x2x128xf32>
    %40 = vector.shape_cast %39 : vector<1x2x128xf32> to vector<2x128xf32>
    %41 = vector.shape_cast %38 : vector<2x128xf32> to vector<1x2x128xf32>
    tpu.vector_store %arg8[%c0_21, %c0_22, %c0_23], %41 {strides = array<i32>} : memref<1x2x128xf32, #tpu.memory_space<vmem>>, vector<1x2x128xf32>,
    %42 = arith.truncf %32 : vector<256x128xf32> to vector<256x128xbf16>
    %c0_24 = arith.constant 0 : index
    %c0_25 = arith.constant 0 : index
    %c0_26 = arith.constant 0 : index
    %43 = vector.load %arg7[%c0_24, %c0_25, %c0_26] : memref<1x256x128xbf16, #tpu.memory_space<vmem>>, vector<1x256x128xbf16>
    %44 = vector.shape_cast %43 : vector<1x256x128xbf16> to vector<256x128xbf16>
    %45 = vector.shape_cast %42 : vector<256x128xbf16> to vector<1x256x128xbf16>
    tpu.vector_store %arg7[%c0_24, %c0_25, %c0_26], %45 {strides = array<i32>} : memref<1x256x128xbf16, #tpu.memory_space<vmem>>, vector<1x256x128xbf16>,
    return
  }
  func.func @transform_0(%arg0: i32, %arg1: i32) -> (i32, i32, i32) {
    %c0_i32 = arith.constant 0 : i32
    %c0_i32_0 = arith.constant 0 : i32
    return %arg0, %arg1, %c0_i32 : i32, i32, i32
  }
  func.func @transform_1(%arg0: i32, %arg1: i32) -> (i32, i32, i32) {
    %c1_i32 = arith.constant 1 : i32
    %0 = arith.muli %arg0, %c1_i32 : i32
    %1 = arith.addi %0, %arg1 : i32
    %c0_i32 = arith.constant 0 : i32
    %c0_i32_0 = arith.constant 0 : i32
    %c0_i32_1 = arith.constant 0 : i32
    return %1, %c0_i32, %c0_i32_0 : i32, i32, i32
  }
  func.func @transform_2(%arg0: i32, %arg1: i32) -> (i32, i32) {
    %c0_i32 = arith.constant 0 : i32
    %c0_i32_0 = arith.constant 0 : i32
    %c0_i32_1 = arith.constant 0 : i32
    return %c0_i32, %c0_i32_0 : i32, i32
  }
  func.func @transform_3(%arg0: i32, %arg1: i32) -> (i32, i32) {
    %c0_i32 = arith.constant 0 : i32
    %c0_i32_0 = arith.constant 0 : i32
    %c0_i32_1 = arith.constant 0 : i32
    return %c0_i32, %c0_i32_0 : i32, i32
  }
  func.func @transform_4(%arg0: i32, %arg1: i32) -> (i32, i32, i32) {
    %c0_i32 = arith.constant 0 : i32
    %c0_i32_0 = arith.constant 0 : i32
    %c0_i32_1 = arith.constant 0 : i32
    %c0_i32_2 = arith.constant 0 : i32
    return %c0_i32, %c0_i32_0, %c0_i32_1 : i32, i32, i32
  }
  func.func @transform_5(%arg0: i32, %arg1: i32) -> (i32, i32, i32) {
    %c0_i32 = arith.constant 0 : i32
    %c0_i32_0 = arith.constant 0 : i32
    return %arg0, %arg1, %c0_i32 : i32, i32, i32
  }
  func.func @transform_6(%arg0: i32, %arg1: i32) -> (i32, i32, i32) {
    %c1_i32 = arith.constant 1 : i32
    %0 = arith.muli %arg0, %c1_i32 : i32
    %1 = arith.addi %0, %arg1 : i32
    %c0_i32 = arith.constant 0 : i32
    %c0_i32_0 = arith.constant 0 : i32
    %c0_i32_1 = arith.constant 0 : i32
    return %1, %c0_i32, %c0_i32_0 : i32, i32, i32
  }
}

module attributes {stable_mosaic.version = 11 : i64} {
  func.func @_conv1_kernel(%arg0: i32, %arg1: i32, %arg2: memref<1x256x128xf32, #tpu.memory_space<vmem>>, %arg3: memref<1x2x128xf32, #tpu.memory_space<vmem>>, %arg4: memref<3x128x128xbf16, #tpu.memory_space<vmem>>, %arg5: memref<1x256x128xbf16, #tpu.memory_space<vmem>>, %arg6: memref<1x2x128xf32, #tpu.memory_space<vmem>>) attributes {dimension_semantics = [#tpu.dimension_semantics<parallel>, #tpu.dimension_semantics<parallel>], iteration_bounds = array<i64: 2, 1>, scalar_prefetch = 0 : i64, scratch_operands = 0 : i64, tpu.core_type = #tpu.core_type<tc>, window_params = [{transform_indices = @transform_0, window_bounds = array<i64: 1, 256, 128>}, {transform_indices = @transform_1, window_bounds = array<i64: 1, 2, 128>}, {pipeline_mode = #tpu.pipeline_mode<synchronous>, transform_indices = @transform_2, window_bounds = array<i64: 3, 128, 128>}, {transform_indices = @transform_3, window_bounds = array<i64: 1, 256, 128>}, {transform_indices = @transform_4, window_bounds = array<i64: 1, 2, 128>}]} {
    %c0 = arith.constant 0 : index
    %c0_0 = arith.constant 0 : index
    %c0_1 = arith.constant 0 : index
    %0 = vector.load %arg2[%c0, %c0_0, %c0_1] : memref<1x256x128xf32, #tpu.memory_space<vmem>>, vector<1x256x128xf32>
    %1 = vector.shape_cast %0 : vector<1x256x128xf32> to vector<256x128xf32>
    %c0_2 = arith.constant 0 : index
    %c0_3 = arith.constant 0 : index
    %c0_4 = arith.constant 0 : index
    %2 = vector.load %arg3[%c0_2, %c0_3, %c0_4] : memref<1x2x128xf32, #tpu.memory_space<vmem>>, vector<1x2x128xf32>
    %3 = vector.shape_cast %2 : vector<1x2x128xf32> to vector<2x128xf32>
    %4 = vector.extract_strided_slice %3 {offsets = [0, 0], sizes = [1, 128], strides = [1, 1]} : vector<2x128xf32> to vector<1x128xf32>
    %5 = vector.extract_strided_slice %3 {offsets = [1, 0], sizes = [1, 128], strides = [1, 1]} : vector<2x128xf32> to vector<1x128xf32>
    %6 = vector.extract_strided_slice %1 {offsets = [0, 0], sizes = [255, 128], strides = [1, 1]} : vector<256x128xf32> to vector<255x128xf32>
    %7 = tpu.concatenate %4, %6 in 0 : vector<1x128xf32>, vector<255x128xf32> -> vector<256x128xf32>
    %8 = vector.extract_strided_slice %1 {offsets = [1, 0], sizes = [255, 128], strides = [1, 1]} : vector<256x128xf32> to vector<255x128xf32>
    %9 = tpu.concatenate %8, %5 in 0 : vector<255x128xf32>, vector<1x128xf32> -> vector<256x128xf32>
    %10 = arith.truncf %7 : vector<256x128xf32> to vector<256x128xbf16>
    %c0_5 = arith.constant 0 : index
    %c0_6 = arith.constant 0 : index
    %c0_7 = arith.constant 0 : index
    %11 = vector.load %arg4[%c0_5, %c0_6, %c0_7] : memref<3x128x128xbf16, #tpu.memory_space<vmem>>, vector<1x128x128xbf16>
    %12 = vector.shape_cast %11 : vector<1x128x128xbf16> to vector<128x128xbf16>
    %cst = arith.constant dense<0.000000e+00> : vector<256x128xf32>
    %13 = tpu.matmul %10, %12, %cst {dimension_numbers = #tpu.dot_dimension_numbers<[1], [0], [0], [1], [0, 0, 1, 1], [], []>} : vector<256x128xbf16>, vector<128x128xbf16>, vector<256x128xf32> -> vector<256x128xf32>
    %14 = arith.truncf %1 : vector<256x128xf32> to vector<256x128xbf16>
    %c1 = arith.constant 1 : index
    %c0_8 = arith.constant 0 : index
    %c0_9 = arith.constant 0 : index
    %15 = vector.load %arg4[%c1, %c0_8, %c0_9] : memref<3x128x128xbf16, #tpu.memory_space<vmem>>, vector<1x128x128xbf16>
    %16 = vector.shape_cast %15 : vector<1x128x128xbf16> to vector<128x128xbf16>
    %cst_10 = arith.constant dense<0.000000e+00> : vector<256x128xf32>
    %17 = tpu.matmul %14, %16, %cst_10 {dimension_numbers = #tpu.dot_dimension_numbers<[1], [0], [0], [1], [0, 0, 1, 1], [], []>} : vector<256x128xbf16>, vector<128x128xbf16>, vector<256x128xf32> -> vector<256x128xf32>
    %18 = arith.addf %13, %17 : vector<256x128xf32>
    %19 = arith.truncf %9 : vector<256x128xf32> to vector<256x128xbf16>
    %c2 = arith.constant 2 : index
    %c0_11 = arith.constant 0 : index
    %c0_12 = arith.constant 0 : index
    %20 = vector.load %arg4[%c2, %c0_11, %c0_12] : memref<3x128x128xbf16, #tpu.memory_space<vmem>>, vector<1x128x128xbf16>
    %21 = vector.shape_cast %20 : vector<1x128x128xbf16> to vector<128x128xbf16>
    %cst_13 = arith.constant dense<0.000000e+00> : vector<256x128xf32>
    %22 = tpu.matmul %19, %21, %cst_13 {dimension_numbers = #tpu.dot_dimension_numbers<[1], [0], [0], [1], [0, 0, 1, 1], [], []>} : vector<256x128xbf16>, vector<128x128xbf16>, vector<256x128xf32> -> vector<256x128xf32>
    %23 = arith.addf %18, %22 : vector<256x128xf32>
    %cst_14 = arith.constant dense<0.000000e+00> : vector<128xf32>
    %24 = vector.multi_reduction <add>, %23, %cst_14 [0] : vector<256x128xf32> to vector<128xf32>
    %25 = vector.shape_cast %24 : vector<128xf32> to vector<1x128xf32>
    %26 = arith.mulf %23, %23 : vector<256x128xf32>
    %cst_15 = arith.constant dense<0.000000e+00> : vector<128xf32>
    %27 = vector.multi_reduction <add>, %26, %cst_15 [0] : vector<256x128xf32> to vector<128xf32>
    %28 = vector.shape_cast %27 : vector<128xf32> to vector<1x128xf32>
    %29 = tpu.concatenate %25, %28 in 0 : vector<1x128xf32>, vector<1x128xf32> -> vector<2x128xf32>
    %c0_16 = arith.constant 0 : index
    %c0_17 = arith.constant 0 : index
    %c0_18 = arith.constant 0 : index
    %30 = vector.load %arg6[%c0_16, %c0_17, %c0_18] : memref<1x2x128xf32, #tpu.memory_space<vmem>>, vector<1x2x128xf32>
    %31 = vector.shape_cast %30 : vector<1x2x128xf32> to vector<2x128xf32>
    %32 = vector.shape_cast %29 : vector<2x128xf32> to vector<1x2x128xf32>
    tpu.vector_store %arg6[%c0_16, %c0_17, %c0_18], %32 {strides = array<i32>} : memref<1x2x128xf32, #tpu.memory_space<vmem>>, vector<1x2x128xf32>,
    %33 = arith.truncf %23 : vector<256x128xf32> to vector<256x128xbf16>
    %c0_19 = arith.constant 0 : index
    %c0_20 = arith.constant 0 : index
    %c0_21 = arith.constant 0 : index
    %34 = vector.load %arg5[%c0_19, %c0_20, %c0_21] : memref<1x256x128xbf16, #tpu.memory_space<vmem>>, vector<1x256x128xbf16>
    %35 = vector.shape_cast %34 : vector<1x256x128xbf16> to vector<256x128xbf16>
    %36 = vector.shape_cast %33 : vector<256x128xbf16> to vector<1x256x128xbf16>
    tpu.vector_store %arg5[%c0_19, %c0_20, %c0_21], %36 {strides = array<i32>} : memref<1x256x128xbf16, #tpu.memory_space<vmem>>, vector<1x256x128xbf16>,
    return
  }
  func.func @transform_0(%arg0: i32, %arg1: i32) -> (i32, i32, i32) {
    %c0_i32 = arith.constant 0 : i32
    %c0_i32_0 = arith.constant 0 : i32
    return %arg0, %arg1, %c0_i32 : i32, i32, i32
  }
  func.func @transform_1(%arg0: i32, %arg1: i32) -> (i32, i32, i32) {
    %c1_i32 = arith.constant 1 : i32
    %0 = arith.muli %arg0, %c1_i32 : i32
    %1 = arith.addi %0, %arg1 : i32
    %c0_i32 = arith.constant 0 : i32
    %c0_i32_0 = arith.constant 0 : i32
    %c0_i32_1 = arith.constant 0 : i32
    return %1, %c0_i32, %c0_i32_0 : i32, i32, i32
  }
  func.func @transform_2(%arg0: i32, %arg1: i32) -> (i32, i32, i32) {
    %c0_i32 = arith.constant 0 : i32
    %c0_i32_0 = arith.constant 0 : i32
    %c0_i32_1 = arith.constant 0 : i32
    %c0_i32_2 = arith.constant 0 : i32
    return %c0_i32, %c0_i32_0, %c0_i32_1 : i32, i32, i32
  }
  func.func @transform_3(%arg0: i32, %arg1: i32) -> (i32, i32, i32) {
    %c0_i32 = arith.constant 0 : i32
    %c0_i32_0 = arith.constant 0 : i32
    return %arg0, %arg1, %c0_i32 : i32, i32, i32
  }
  func.func @transform_4(%arg0: i32, %arg1: i32) -> (i32, i32, i32) {
    %c1_i32 = arith.constant 1 : i32
    %0 = arith.muli %arg0, %c1_i32 : i32
    %1 = arith.addi %0, %arg1 : i32
    %c0_i32 = arith.constant 0 : i32
    %c0_i32_0 = arith.constant 0 : i32
    %c0_i32_1 = arith.constant 0 : i32
    return %1, %c0_i32, %c0_i32_0 : i32, i32, i32
  }
}

module attributes {stable_mosaic.version = 11 : i64} {
  func.func @_bn_add_relu_kernel(%arg0: i32, %arg1: i32, %arg2: memref<1x256x128xbf16, #tpu.memory_space<vmem>>, %arg3: memref<1x256x128xf32, #tpu.memory_space<vmem>>, %arg4: memref<1x128xf32, #tpu.memory_space<vmem>>, %arg5: memref<1x128xf32, #tpu.memory_space<vmem>>, %arg6: memref<1x256x128xf32, #tpu.memory_space<vmem>>) attributes {dimension_semantics = [#tpu.dimension_semantics<parallel>, #tpu.dimension_semantics<parallel>], iteration_bounds = array<i64: 2, 1>, scalar_prefetch = 0 : i64, scratch_operands = 0 : i64, tpu.core_type = #tpu.core_type<tc>, window_params = [{transform_indices = @transform_0, window_bounds = array<i64: 1, 256, 128>}, {transform_indices = @transform_1, window_bounds = array<i64: 1, 256, 128>}, {pipeline_mode = #tpu.pipeline_mode<synchronous>, transform_indices = @transform_2, window_bounds = array<i64: 1, 128>}, {pipeline_mode = #tpu.pipeline_mode<synchronous>, transform_indices = @transform_3, window_bounds = array<i64: 1, 128>}, {transform_indices = @transform_4, window_bounds = array<i64: 1, 256, 128>}]} {
    %c0 = arith.constant 0 : index
    %c0_0 = arith.constant 0 : index
    %c0_1 = arith.constant 0 : index
    %0 = vector.load %arg2[%c0, %c0_0, %c0_1] : memref<1x256x128xbf16, #tpu.memory_space<vmem>>, vector<1x256x128xbf16>
    %1 = vector.shape_cast %0 : vector<1x256x128xbf16> to vector<256x128xbf16>
    %2 = arith.extf %1 : vector<256x128xbf16> to vector<256x128xf32>
    %c0_2 = arith.constant 0 : index
    %c0_3 = arith.constant 0 : index
    %3 = vector.load %arg4[%c0_2, %c0_3] : memref<1x128xf32, #tpu.memory_space<vmem>>, vector<1x128xf32>
    %4 = vector.broadcast %3 : vector<1x128xf32> to vector<256x128xf32>
    %5 = arith.mulf %2, %4 : vector<256x128xf32>
    %c0_4 = arith.constant 0 : index
    %c0_5 = arith.constant 0 : index
    %6 = vector.load %arg5[%c0_4, %c0_5] : memref<1x128xf32, #tpu.memory_space<vmem>>, vector<1x128xf32>
    %7 = vector.broadcast %6 : vector<1x128xf32> to vector<256x128xf32>
    %8 = arith.addf %5, %7 : vector<256x128xf32>
    %c0_6 = arith.constant 0 : index
    %c0_7 = arith.constant 0 : index
    %c0_8 = arith.constant 0 : index
    %9 = vector.load %arg3[%c0_6, %c0_7, %c0_8] : memref<1x256x128xf32, #tpu.memory_space<vmem>>, vector<1x256x128xf32>
    %10 = vector.shape_cast %9 : vector<1x256x128xf32> to vector<256x128xf32>
    %11 = arith.addf %8, %10 : vector<256x128xf32>
    %cst = arith.constant 0.000000e+00 : f32
    %12 = vector.broadcast %cst : f32 to vector<256x128xf32>
    %13 = arith.maximumf %11, %12 : vector<256x128xf32>
    %c0_9 = arith.constant 0 : index
    %c0_10 = arith.constant 0 : index
    %c0_11 = arith.constant 0 : index
    %14 = vector.load %arg6[%c0_9, %c0_10, %c0_11] : memref<1x256x128xf32, #tpu.memory_space<vmem>>, vector<1x256x128xf32>
    %15 = vector.shape_cast %14 : vector<1x256x128xf32> to vector<256x128xf32>
    %16 = vector.shape_cast %13 : vector<256x128xf32> to vector<1x256x128xf32>
    tpu.vector_store %arg6[%c0_9, %c0_10, %c0_11], %16 {strides = array<i32>} : memref<1x256x128xf32, #tpu.memory_space<vmem>>, vector<1x256x128xf32>,
    return
  }
  func.func @transform_0(%arg0: i32, %arg1: i32) -> (i32, i32, i32) {
    %c0_i32 = arith.constant 0 : i32
    %c0_i32_0 = arith.constant 0 : i32
    return %arg0, %arg1, %c0_i32 : i32, i32, i32
  }
  func.func @transform_1(%arg0: i32, %arg1: i32) -> (i32, i32, i32) {
    %c0_i32 = arith.constant 0 : i32
    %c0_i32_0 = arith.constant 0 : i32
    return %arg0, %arg1, %c0_i32 : i32, i32, i32
  }
  func.func @transform_2(%arg0: i32, %arg1: i32) -> (i32, i32) {
    %c0_i32 = arith.constant 0 : i32
    %c0_i32_0 = arith.constant 0 : i32
    %c0_i32_1 = arith.constant 0 : i32
    return %c0_i32, %c0_i32_0 : i32, i32
  }
  func.func @transform_3(%arg0: i32, %arg1: i32) -> (i32, i32) {
    %c0_i32 = arith.constant 0 : i32
    %c0_i32_0 = arith.constant 0 : i32
    %c0_i32_1 = arith.constant 0 : i32
    return %c0_i32, %c0_i32_0 : i32, i32
  }
  func.func @transform_4(%arg0: i32, %arg1: i32) -> (i32, i32, i32) {
    %c0_i32 = arith.constant 0 : i32
    %c0_i32_0 = arith.constant 0 : i32
    return %arg0, %arg1, %c0_i32 : i32, i32, i32
  }
}

</mosaic_0001>

<bundles_post_ra>
// kernel: basic_block_pallas.5
= control target key start
LH: loop header
LB: loop body
LE: loop exit
PB: predicated region body
PF: predicated region fallthrough
CT: control target
= control target key end

     0   :  { %s818_s15 = smov 0   ;;  %s820_s16 = smov 0   ;;  %s1022_s0 = inlined_call_operand.vmem [shape: bf16[2,256,128], index: 0, kind: input, shape index: {}]   ;;  %s1023_s1 = inlined_call_operand.vmem [shape: f32[2,256,128], index: 1, kind: input, shape index: {}]   ;;  %s1024_s2 = inlined_call_operand.vmem [shape: f32[1,128], index: 2, kind: input, shape index: {}]   ;;  %s1025_s3 = inlined_call_operand.vmem [shape: f32[1,128], index: 3, kind: input, shape index: {}]   ;;  %s1026_s4 = inlined_call_operand.vmem [shape: f32[2,256,128], index: 4, kind: output, shape index: {}]  }
   0x1   :  { %s822_s17 = smov 0  }
   0x2 LB: > { %s26_s18 = sadd.s32 1, %s787_s16  ;;  %p652_p0 = scmp.ge.s32.totalorder %s791_s17, 1  ;;  %s791_s17 = sphi %s822_s17, %s14_s17   ;;  %s787_s16 = sphi %s820_s16, %s1028_s16   ;;  %s783_s15 = sphi %s818_s15, %s1027_s15  }
   0x3   : > { %p28_p1 = scmp.ge.s32.totalorder %s26_s18, 2  ;;  %p200_p2 = scmp.lt.s32.totalorder %s791_s17, 3 }
   0x5   : > { %s1030_s18 = smov (%p28_p1, %s26_s18), 0  ;;  %p201_p3 = pnand %p652_p0, %p200_p2 }
   0x6   : > { %p244_p4 = scmp.lt.s32.totalorder (!%p201_p3), %s783_s15, 1  ;;  %v849_v1 = vld [vmem:[%s1024_s2] ss:$0 sm:$0xff] (!%p201_p3) }
   0x7   : > { %204 = sbr.rel (%p201_p3) target bundleno = 61 (0x3d), region = 36  ;;  %v862_v5 = vld [vmem:[%s1025_s3] ss:$0 sm:$0xff] (!%p201_p3) }
   0xe   : > { %s1032_s15 = smov (!%p244_p4, %s783_s15), 1 }
   0xf   : > { %s663_s19 = sshll.u32 %s1032_s15, 7  ;;  %s664_s20 = sshll.u32 %s1032_s15, 8 }
  0x10   : > { %s843_s23 = scalar_lea.vmem %s1022_s0, %s663_s19  ;;  %s856_s28 = scalar_lea.vmem %s1023_s1, %s664_s20 }
  0x11   : > { %v667_v0 = vld [vmem:[%s843_s23] sm:$0xff]   ;;  %v730_v4 = vld [vmem:[%s843_s23 + $0x8] sm:$0xff]   ;;  %v731_v8 = vld [vmem:[%s843_s23 + $0x10] sm:$0xff]   ;;  %s893_s7 = scalar_lea.vmem %s1026_s4, %s664_s20 }
  0x12   : > { %v668_v2 = vunpack.c.l.bf16 %v667_v0  ;;  %v669_v3 = vunpack.c.h.bf16 %v667_v0  ;;  %v672_v6 = vunpack.c.l.bf16 %v730_v4  ;;  %v673_v7 = vunpack.c.h.bf16 %v730_v4  ;;  %v732_v13 = vld [vmem:[%s843_s23 + $0x18] sm:$0xff]   ;;  %v415_v14 = vld [vmem:[%s856_s28] sm:$0xff]  ;;  %v416_v15 = vld [vmem:[%s856_s28 + $0x8] sm:$0xff] }
  0x13   : > { %v676_v11 = vunpack.c.l.bf16 %v731_v8  ;;  %v677_v12 = vunpack.c.h.bf16 %v731_v8  ;;  %v680_v18 = vunpack.c.l.bf16 %v732_v13  ;;  %v681_v19 = vunpack.c.h.bf16 %v732_v13  ;;  %v417_v22 = vld [vmem:[%s856_s28 + $0x10] sm:$0xff]  ;;  %v418_v23 = vld [vmem:[%s856_s28 + $0x18] sm:$0xff]  ;;  %v419_v28 = vld [vmem:[%s856_s28 + $0x20] sm:$0xff] }
  0x14   : > { %v344_v9 = vmul.f32 %v668_v2, %v849_v1  ;;  %v345_v10 = vmul.f32 %v669_v3, %v849_v1  ;;  %v346_v16 = vmul.f32 %v672_v6, %v849_v1  ;;  %v347_v17 = vmul.f32 %v673_v7, %v849_v1  ;;  %v420_v29 = vld [vmem:[%s856_s28 + $0x28] sm:$0xff]  ;;  %v421_v36 = vld [vmem:[%s856_s28 + $0x30] sm:$0xff]  ;;  %v422_v37 = vld [vmem:[%s856_s28 + $0x38] sm:$0xff] }
  0x15   : > { %v348_v24 = vmul.f32 %v676_v11, %v849_v1  ;;  %v349_v25 = vmul.f32 %v677_v12, %v849_v1  ;;  %v350_v30 = vmul.f32 %v680_v18, %v849_v1  ;;  %v351_v31 = vmul.f32 %v681_v19, %v849_v1  ;;  %v733_v42 = vld [vmem:[%s843_s23 + $0x20] sm:$0xff]   ;;  %v734_v47 = vld [vmem:[%s843_s23 + $0x28] sm:$0xff]   ;;  %v735_v52 = vld [vmem:[%s843_s23 + $0x30] sm:$0xff]  }
  0x16   : > { %v383_v20 = vadd.f32 %v862_v5, %v344_v9  ;;  %v384_v21 = vadd.f32 %v862_v5, %v345_v10  ;;  %v385_v26 = vadd.f32 %v862_v5, %v346_v16  ;;  %v386_v27 = vadd.f32 %v862_v5, %v347_v17  ;;  %v736_v57 = vld [vmem:[%s843_s23 + $0x38] sm:$0xff]   ;;  %v423_v3 = vld [vmem:[%s856_s28 + $0x40] sm:$0xff]  ;;  %v424_v4 = vld [vmem:[%s856_s28 + $0x48] sm:$0xff] }
  0x17   : > { %v387_v34 = vadd.f32 %v862_v5, %v348_v24  ;;  %v388_v35 = vadd.f32 %v862_v5, %v349_v25  ;;  %v389_v40 = vadd.f32 %v862_v5, %v350_v30  ;;  %v390_v41 = vadd.f32 %v862_v5, %v351_v31  ;;  %v425_v12 = vld [vmem:[%s856_s28 + $0x50] sm:$0xff]  ;;  %v426_v13 = vld [vmem:[%s856_s28 + $0x58] sm:$0xff]  ;;  %v427_v18 = vld [vmem:[%s856_s28 + $0x60] sm:$0xff] }
  0x18   : > { %v447_v32 = vadd.f32 %v415_v14, %v383_v20  ;;  %v448_v33 = vadd.f32 %v416_v15, %v384_v21  ;;  %v449_v38 = vadd.f32 %v417_v22, %v385_v26  ;;  %v450_v39 = vadd.f32 %v418_v23, %v386_v27  ;;  %v428_v19 = vld [vmem:[%s856_s28 + $0x68] sm:$0xff]  ;;  %v429_v26 = vld [vmem:[%s856_s28 + $0x70] sm:$0xff]  ;;  %v430_v27 = vld [vmem:[%s856_s28 + $0x78] sm:$0xff] }
  0x19   : > { %v451_v45 = vadd.f32 %v419_v28, %v387_v34  ;;  %v452_v46 = vadd.f32 %v420_v29, %v388_v35  ;;  %v453_v50 = vadd.f32 %v421_v36, %v389_v40  ;;  %v454_v51 = vadd.f32 %v422_v37, %v390_v41  ;;  %v738_v37 = vld [vmem:[%s843_s23 + $0x48] sm:$0xff]  }
  0x1a   : > { %v479_v43 = vmax.f32 %v447_v32, 0.0  ;;  %v480_v44 = vmax.f32 %v448_v33, 0.0  ;;  %v481_v48 = vmax.f32 %v449_v38, 0.0  ;;  %v482_v49 = vmax.f32 %v450_v39, 0.0  ;;  %v737_v32 = vld [vmem:[%s843_s23 + $0x40] sm:$0xff]  }
  0x1b   : > { %v483_v53 = vmax.f32 %v451_v45, 0.0  ;;  %v484_v54 = vmax.f32 %v452_v46, 0.0  ;;  %v684_v55 = vunpack.c.l.bf16 %v733_v42  ;;  %v685_v56 = vunpack.c.h.bf16 %v733_v42  ;;  %v739_v42 = vld [vmem:[%s843_s23 + $0x50] sm:$0xff]  }
  0x1c   : > { %511 = vst [vmem:[%s893_s7] sm:$0xff] %v479_v43  ;;  %512 = vst [vmem:[%s893_s7 + $0x8] sm:$0xff] %v480_v44  ;;  %v485_v58 = vmax.f32 %v453_v50, 0.0  ;;  %v486_v59 = vmax.f32 %v454_v51, 0.0  ;;  %v688_v60 = vunpack.c.l.bf16 %v734_v47  ;;  %v689_v61 = vunpack.c.h.bf16 %v734_v47  ;;  %v740_v47 = vld [vmem:[%s843_s23 + $0x58] sm:$0xff]  }
  0x1d   : > { %513 = vst [vmem:[%s893_s7 + $0x10] sm:$0xff] %v481_v48  ;;  %514 = vst [vmem:[%s893_s7 + $0x18] sm:$0xff] %v482_v49  ;;  %v352_v62 = vmul.f32 %v684_v55, %v849_v1  ;;  %v353_v63 = vmul.f32 %v685_v56, %v849_v1  ;;  %v692_v0 = vunpack.c.l.bf16 %v735_v52  ;;  %v693_v2 = vunpack.c.h.bf16 %v735_v52  ;;  %v431_v56 = vld [vmem:[%s856_s28 + $0x80] sm:$0xff] }
  0x1e   : > { %515 = vst [vmem:[%s893_s7 + $0x20] sm:$0xff] %v483_v53  ;;  %516 = vst [vmem:[%s893_s7 + $0x28] sm:$0xff] %v484_v54  ;;  %v354_v6 = vmul.f32 %v688_v60, %v849_v1  ;;  %v355_v7 = vmul.f32 %v689_v61, %v849_v1  ;;  %v696_v8 = vunpack.c.l.bf16 %v736_v57  ;;  %v697_v9 = vunpack.c.h.bf16 %v736_v57  ;;  %v432_v57 = vld [vmem:[%s856_s28 + $0x88] sm:$0xff] }
  0x1f   : > { %517 = vst [vmem:[%s893_s7 + $0x30] sm:$0xff] %v485_v58  ;;  %518 = vst [vmem:[%s893_s7 + $0x38] sm:$0xff] %v486_v59  ;;  %v391_v10 = vadd.f32 %v862_v5, %v352_v62  ;;  %v392_v11 = vadd.f32 %v862_v5, %v353_v63  ;;  %v356_v14 = vmul.f32 %v692_v0, %v849_v1  ;;  %v700_v45 = vunpack.c.l.bf16 %v737_v32  ;;  %v433_v0 = vld [vmem:[%s856_s28 + $0x90] sm:$0xff] }
  0x20   : > { %v357_v15 = vmul.f32 %v693_v2, %v849_v1  ;;  %v393_v16 = vadd.f32 %v862_v5, %v354_v6  ;;  %v394_v17 = vadd.f32 %v862_v5, %v355_v7  ;;  %v358_v20 = vmul.f32 %v696_v8, %v849_v1  ;;  %v434_v2 = vld [vmem:[%s856_s28 + $0x98] sm:$0xff]  ;;  %v435_v8 = vld [vmem:[%s856_s28 + $0xa0] sm:$0xff] }
  0x21   : > { %v359_v21 = vmul.f32 %v697_v9, %v849_v1  ;;  %v455_v22 = vadd.f32 %v423_v3, %v391_v10  ;;  %v456_v23 = vadd.f32 %v424_v4, %v392_v11  ;;  %v395_v24 = vadd.f32 %v862_v5, %v356_v14  ;;  %v436_v9 = vld [vmem:[%s856_s28 + $0xa8] sm:$0xff] }
  0x22   : > { %v396_v25 = vadd.f32 %v862_v5, %v357_v15  ;;  %v457_v28 = vadd.f32 %v425_v12, %v393_v16  ;;  %v458_v29 = vadd.f32 %v426_v13, %v394_v17  ;;  %v397_v30 = vadd.f32 %v862_v5, %v358_v20  ;;  %v437_v16 = vld [vmem:[%s856_s28 + $0xb0] sm:$0xff]  ;;  %v438_v17 = vld [vmem:[%s856_s28 + $0xb8] sm:$0xff] }
  0x23   : > { %v398_v31 = vadd.f32 %v862_v5, %v359_v21  ;;  %v487_v33 = vmax.f32 %v455_v22, 0.0  ;;  %v488_v34 = vmax.f32 %v456_v23, 0.0  ;;  %v459_v35 = vadd.f32 %v427_v18, %v395_v24  ;;  %v741_v22 = vld [vmem:[%s843_s23 + $0x60] sm:$0xff]  }
  0x24   : > { %v460_v36 = vadd.f32 %v428_v19, %v396_v25  ;;  %v489_v38 = vmax.f32 %v457_v28, 0.0  ;;  %v490_v39 = vmax.f32 %v458_v29, 0.0  ;;  %v461_v40 = vadd.f32 %v429_v26, %v397_v30 }
  0x25   : > { %v462_v41 = vadd.f32 %v430_v27, %v398_v31  ;;  %519 = vst [vmem:[%s893_s7 + $0x40] sm:$0xff] %v487_v33  ;;  %520 = vst [vmem:[%s893_s7 + $0x48] sm:$0xff] %v488_v34  ;;  %v491_v43 = vmax.f32 %v459_v35, 0.0  ;;  %v701_v46 = vunpack.c.h.bf16 %v737_v32  ;;  %v704_v50 = vunpack.c.l.bf16 %v738_v37  ;;  %v742_v27 = vld [vmem:[%s843_s23 + $0x68] sm:$0xff]   ;;  %v743_v32 = vld [vmem:[%s843_s23 + $0x70] sm:$0xff]  }
  0x26   : > { %v492_v44 = vmax.f32 %v460_v36, 0.0  ;;  %521 = vst [vmem:[%s893_s7 + $0x50] sm:$0xff] %v489_v38  ;;  %522 = vst [vmem:[%s893_s7 + $0x58] sm:$0xff] %v490_v39  ;;  %v493_v48 = vmax.f32 %v461_v40, 0.0  ;;  %v705_v51 = vunpack.c.h.bf16 %v738_v37  ;;  %v360_v52 = vmul.f32 %v700_v45, %v849_v1  ;;  %v744_v37 = vld [vmem:[%s843_s23 + $0x78] sm:$0xff]  }
  0x27   : > { %v494_v49 = vmax.f32 %v462_v41, 0.0  ;;  %523 = vst [vmem:[%s893_s7 + $0x60] sm:$0xff] %v491_v43  ;;  %v361_v53 = vmul.f32 %v701_v46, %v849_v1  ;;  %v708_v54 = vunpack.c.l.bf16 %v739_v42  ;;  %v709_v55 = vunpack.c.h.bf16 %v739_v42  ;;  %v439_v46 = vld [vmem:[%s856_s28 + $0xc0] sm:$0xff] }
  0x28   : > { %524 = vst [vmem:[%s893_s7 + $0x68] sm:$0xff] %v492_v44  ;;  %525 = vst [vmem:[%s893_s7 + $0x70] sm:$0xff] %v493_v48  ;;  %v362_v58 = vmul.f32 %v704_v50, %v849_v1  ;;  %v363_v59 = vmul.f32 %v705_v51, %v849_v1  ;;  %v712_v60 = vunpack.c.l.bf16 %v740_v47  ;;  %v713_v61 = vunpack.c.h.bf16 %v740_v47  ;;  %v440_v47 = vld [vmem:[%s856_s28 + $0xc8] sm:$0xff] }
  0x29   : > { %526 = vst [vmem:[%s893_s7 + $0x78] sm:$0xff] %v494_v49  ;;  %v399_v62 = vadd.f32 %v862_v5, %v360_v52  ;;  %v400_v63 = vadd.f32 %v862_v5, %v361_v53  ;;  %v364_v3 = vmul.f32 %v708_v54, %v849_v1  ;;  %v365_v4 = vmul.f32 %v709_v55, %v849_v1  ;;  %v441_v54 = vld [vmem:[%s856_s28 + $0xd0] sm:$0xff]  ;;  %v442_v55 = vld [vmem:[%s856_s28 + $0xd8] sm:$0xff] }
  0x2a   : > { %v401_v6 = vadd.f32 %v862_v5, %v362_v58  ;;  %v402_v7 = vadd.f32 %v862_v5, %v363_v59  ;;  %v366_v10 = vmul.f32 %v712_v60, %v849_v1  ;;  %v367_v11 = vmul.f32 %v713_v61, %v849_v1  ;;  %v443_v60 = vld [vmem:[%s856_s28 + $0xe0] sm:$0xff]  ;;  %v444_v61 = vld [vmem:[%s856_s28 + $0xe8] sm:$0xff] }
  0x2b   : > { %v463_v12 = vadd.f32 %v431_v56, %v399_v62  ;;  %v464_v13 = vadd.f32 %v432_v57, %v400_v63  ;;  %v403_v14 = vadd.f32 %v862_v5, %v364_v3  ;;  %v404_v15 = vadd.f32 %v862_v5, %v365_v4 }
  0x2c   : > { %v465_v18 = vadd.f32 %v433_v0, %v401_v6  ;;  %v466_v19 = vadd.f32 %v434_v2, %v402_v7  ;;  %v405_v20 = vadd.f32 %v862_v5, %v366_v10  ;;  %v406_v21 = vadd.f32 %v862_v5, %v367_v11  ;;  %v445_v6 = vld [vmem:[%s856_s28 + $0xf0] sm:$0xff]  ;;  %v446_v7 = vld [vmem:[%s856_s28 + $0xf8] sm:$0xff] }
  0x2d   : > { %v495_v23 = vmax.f32 %v463_v12, 0.0  ;;  %v496_v24 = vmax.f32 %v464_v13, 0.0  ;;  %v467_v25 = vadd.f32 %v435_v8, %v403_v14  ;;  %v468_v26 = vadd.f32 %v436_v9, %v404_v15 }
  0x2e   : > { %v497_v28 = vmax.f32 %v465_v18, 0.0  ;;  %v498_v29 = vmax.f32 %v466_v19, 0.0  ;;  %v469_v30 = vadd.f32 %v437_v16, %v405_v20  ;;  %v470_v31 = vadd.f32 %v438_v17, %v406_v21 }
  0x2f   : > { %527 = vst [vmem:[%s893_s7 + $0x80] sm:$0xff] %v495_v23  ;;  %528 = vst [vmem:[%s893_s7 + $0x88] sm:$0xff] %v496_v24  ;;  %v499_v33 = vmax.f32 %v467_v25, 0.0  ;;  %v500_v34 = vmax.f32 %v468_v26, 0.0  ;;  %v716_v35 = vunpack.c.l.bf16 %v741_v22  ;;  %v717_v36 = vunpack.c.h.bf16 %v741_v22 }
  0x30   : > { %529 = vst [vmem:[%s893_s7 + $0x90] sm:$0xff] %v497_v28  ;;  %530 = vst [vmem:[%s893_s7 + $0x98] sm:$0xff] %v498_v29  ;;  %v501_v38 = vmax.f32 %v469_v30, 0.0  ;;  %v502_v39 = vmax.f32 %v470_v31, 0.0  ;;  %v720_v40 = vunpack.c.l.bf16 %v742_v27  ;;  %v721_v41 = vunpack.c.h.bf16 %v742_v27 }
  0x31   : > { %531 = vst [vmem:[%s893_s7 + $0xa0] sm:$0xff] %v499_v33  ;;  %532 = vst [vmem:[%s893_s7 + $0xa8] sm:$0xff] %v500_v34  ;;  %v368_v42 = vmul.f32 %v716_v35, %v849_v1  ;;  %v369_v43 = vmul.f32 %v717_v36, %v849_v1  ;;  %v724_v44 = vunpack.c.l.bf16 %v743_v32  ;;  %v725_v45 = vunpack.c.h.bf16 %v743_v32 }
  0x32   : > { %533 = vst [vmem:[%s893_s7 + $0xb0] sm:$0xff] %v501_v38  ;;  %534 = vst [vmem:[%s893_s7 + $0xb8] sm:$0xff] %v502_v39  ;;  %v370_v48 = vmul.f32 %v720_v40, %v849_v1  ;;  %v371_v49 = vmul.f32 %v721_v41, %v849_v1  ;;  %v728_v50 = vunpack.c.l.bf16 %v744_v37  ;;  %v729_v51 = vunpack.c.h.bf16 %v744_v37 }
  0x33   : > { %v407_v52 = vadd.f32 %v862_v5, %v368_v42  ;;  %v408_v53 = vadd.f32 %v862_v5, %v369_v43  ;;  %v372_v56 = vmul.f32 %v724_v44, %v849_v1  ;;  %v373_v57 = vmul.f32 %v725_v45, %v849_v1 }
  0x34   : > { %v409_v58 = vadd.f32 %v862_v5, %v370_v48  ;;  %v410_v59 = vadd.f32 %v862_v5, %v371_v49  ;;  %v374_v62 = vmul.f32 %v728_v50, %v849_v1  ;;  %v375_v63 = vmul.f32 %v729_v51, %v849_v1 }
  0x35   : > { %v471_v0 = vadd.f32 %v439_v46, %v407_v52  ;;  %v472_v2 = vadd.f32 %v440_v47, %v408_v53  ;;  %v411_v3 = vadd.f32 %v862_v5, %v372_v56  ;;  %v412_v4 = vadd.f32 %v862_v5, %v373_v57 }
  0x36   : > { %v473_v8 = vadd.f32 %v441_v54, %v409_v58  ;;  %v474_v9 = vadd.f32 %v442_v55, %v410_v59  ;;  %v413_v10 = vadd.f32 %v862_v5, %v374_v62  ;;  %v414_v11 = vadd.f32 %v862_v5, %v375_v63 }
  0x37   : > { %v503_v12 = vmax.f32 %v471_v0, 0.0  ;;  %v504_v1 = vmax.f32 %v472_v2, 0.0  ;;  %v475_v13 = vadd.f32 %v443_v60, %v411_v3  ;;  %v476_v14 = vadd.f32 %v444_v61, %v412_v4 }
  0x38   : > { %v505_v15 = vmax.f32 %v473_v8, 0.0  ;;  %v506_v16 = vmax.f32 %v474_v9, 0.0  ;;  %v477_v17 = vadd.f32 %v445_v6, %v413_v10  ;;  %v478_v18 = vadd.f32 %v446_v7, %v414_v11 }
  0x39   : > { %535 = vst [vmem:[%s893_s7 + $0xc0] sm:$0xff] %v503_v12  ;;  %536 = vst [vmem:[%s893_s7 + $0xc8] sm:$0xff] %v504_v1  ;;  %v507_v19 = vmax.f32 %v475_v13, 0.0  ;;  %v508_v20 = vmax.f32 %v476_v14, 0.0 }
  0x3a   : > { %537 = vst [vmem:[%s893_s7 + $0xd0] sm:$0xff] %v505_v15  ;;  %538 = vst [vmem:[%s893_s7 + $0xd8] sm:$0xff] %v506_v16  ;;  %v509_v21 = vmax.f32 %v477_v17, 0.0  ;;  %v510_v5 = vmax.f32 %v478_v18, 0.0 }
  0x3b   : > { %539 = vst [vmem:[%s893_s7 + $0xe0] sm:$0xff] %v507_v19  ;;  %540 = vst [vmem:[%s893_s7 + $0xe8] sm:$0xff] %v508_v20 }
  0x3c   : > { %541 = vst [vmem:[%s893_s7 + $0xf0] sm:$0xff] %v509_v21  ;;  %542 = vst [vmem:[%s893_s7 + $0xf8] sm:$0xff] %v510_v5 }
  0x3d PF: > { %s14_s17 = sadd.s32 1, %s791_s17   ;;  %s1027_s15 = smov %s787_s16 }
  0x3e   : > { %p11_p5 = scmp.ge.s32.totalorder %s14_s17, 4   ;;  %s1028_s16 = smov %s1030_s18 }
  0x40   :  { %13 = sbr.rel (!%p11_p5) target bundleno = 2 (0x2), region = 69 }

// kernel: basic_block_pallas.4
= control target key start
LH: loop header
LB: loop body
LE: loop exit
PB: predicated region body
PF: predicated region fallthrough
CT: control target
= control target key end

     0   :  { %s2608_s21 = smov 0   ;;  %s2610_s22 = smov 0   ;;  %s3134_s0 = inlined_call_operand.vmem [shape: bf16[2,256,128], index: 0, kind: input, shape index: {}]   ;;  %s3135_s1 = inlined_call_operand.vmem [shape: f32[2,2,128], index: 1, kind: input, shape index: {}]   ;;  %s3136_s2 = inlined_call_operand.vmem [shape: f32[1,128], index: 2, kind: input, shape index: {}]   ;;  %s3137_s3 = inlined_call_operand.vmem [shape: f32[1,128], index: 3, kind: input, shape index: {}]   ;;  %s3138_s4 = inlined_call_operand.vmem [shape: bf16[3,128,128], index: 4, kind: input, shape index: {}]   ;;  %s3139_s5 = inlined_call_operand.vmem [shape: bf16[2,256,128], index: 5, kind: output, shape index: {0}]   ;;  %s3140_s6 = inlined_call_operand.vmem [shape: f32[2,2,128], index: 6, kind: output, shape index: {1}]  }
   0x1   :  { %s2612_s23 = smov 0  }
   0x2 LB: > { %s29_s24 = sadd.s32 1, %s2567_s22  ;;  %p1898_p0 = scmp.ge.s32.totalorder %s2571_s23, 1  ;;  %s2571_s23 = sphi %s2612_s23, %s17_s23   ;;  %s2567_s22 = sphi %s2610_s22, %s3142_s22   ;;  %s2563_s21 = sphi %s2608_s21, %s3141_s21  }
   0x3   : > { %p31_p1 = scmp.ge.s32.totalorder %s29_s24, 2  ;;  %p251_p2 = scmp.lt.s32.totalorder %s2571_s23, 3 }
   0x5   : > { %s3144_s24 = smov (%p31_p1, %s29_s24), 0  ;;  %p252_p3 = pnand %p1898_p0, %p251_p2 }
   0x6   : > { %v2525_v0 = vld [vmem:[%s3138_s4 + $0x40] sm:$0xff] (!%p252_p3)   ;;  %v2527_v2 = vld [vmem:[%s3138_s4 + $0x48] sm:$0xff] (!%p252_p3)   ;;  %p300_p4 = scmp.lt.s32.totalorder (!%p252_p3), %s2563_s21, 1  ;;  %v2529_v4 = vld [vmem:[%s3138_s4 + $0x50] sm:$0xff] (!%p252_p3)   ;;  %vm539_vm0 = vcmask (!%p252_p3), 1040384   ;;  %vm636_vm1 = vcmask (!%p252_p3), 1046528  }
   0x7   : > { %255 = sbr.rel (%p252_p3) target bundleno = 367 (0x16f), region = 40  ;;  %v2632_v1 = vld [vmem:[%s3138_s4] sm:$0xff] (!%p252_p3)   ;;  %2277 = vmatprep.subr.bf16.mxu1 (!%p252_p3), %v2525_v0  ;;  %v2641_v3 = vld [vmem:[%s3138_s4 + $0x8] sm:$0xff] (!%p252_p3)   ;;  %v2651_v5 = vld [vmem:[%s3138_s4 + $0x10] sm:$0xff] (!%p252_p3)  }
   0x8   : > { %2325 = vmatprep.subr.bf16.mxu0 (!%p252_p3), %v2632_v1  ;;  %2278 = vmatpush3.bf16.msra.mxu1 (!%p252_p3), %v2525_v0  ;;  %v2531_v6 = vld [vmem:[%s3138_s4 + $0x58] sm:$0xff] (!%p252_p3)   ;;  %v2533_v8 = vld [vmem:[%s3138_s4 + $0x60] sm:$0xff] (!%p252_p3)   ;;  %v2535_v10 = vld [vmem:[%s3138_s4 + $0x68] sm:$0xff] (!%p252_p3)  }
   0x9   : > { %2326 = vmatpush3.bf16.msra.mxu0 (!%p252_p3), %v2632_v1  ;;  %2279 = vmatprep.subr.bf16.mxu1 (!%p252_p3), %v2527_v2  ;;  %v2663_v7 = vld [vmem:[%s3138_s4 + $0x18] sm:$0xff] (!%p252_p3)   ;;  %v2674_v9 = vld [vmem:[%s3138_s4 + $0x20] sm:$0xff] (!%p252_p3)   ;;  %v2697_v13 = vld [vmem:[%s3138_s4 + $0x28] sm:$0xff] (!%p252_p3)  }
   0xa   : > { %2327 = vmatprep.subr.bf16.mxu0 (!%p252_p3), %v2641_v3  ;;  %v2691_v12 = vld [vmem:[%s3136_s2] ss:$0 sm:$0xff] (!%p252_p3)  ;;  %v2537_v20 = vld [vmem:[%s3138_s4 + $0x70] sm:$0xff] (!%p252_p3)   ;;  %v2539_v34 = vld [vmem:[%s3138_s4 + $0x78] sm:$0xff] (!%p252_p3)  }
   0xb   : > { %v2704_v17 = vld [vmem:[%s3137_s3] ss:$0 sm:$0xff] (!%p252_p3)  ;;  %v2720_v29 = vld [vmem:[%s3138_s4 + $0x30] sm:$0xff] (!%p252_p3)   ;;  %v2754_v47 = vld [vmem:[%s3138_s4 + $0x38] sm:$0xff] (!%p252_p3)  }
   0xc   : > { %2280 = vmatpush3.bf16.msra.mxu1 (!%p252_p3), %v2527_v2 }
   0xd   : > { %2328 = vmatpush3.bf16.msra.mxu0 (!%p252_p3), %v2641_v3  ;;  %2281 = vmatprep.subr.bf16.mxu1 (!%p252_p3), %v2529_v4 }
   0xe   : > { %s3146_s21 = smov (!%p300_p4, %s2563_s21), 1  ;;  %2329 = vmatprep.subr.bf16.mxu0 %v2651_v5 }
   0xf   : > { %s1997_s17 = sshll.u32 %s3146_s21, 7  ;;  %s1901_s11 = sshll.u32 %s3146_s21, 1 }
  0x10   : > { %2282 = vmatpush3.bf16.msra.mxu1 %v2529_v4  ;;  %s2681_s28 = scalar_lea.vmem %s3134_s0, %s1997_s17  ;;  %s313_s25 = scalar_lea.vmem %s3135_s1, %s1901_s11  ;;  %v2541_v4 = vld [vmem:[%s3138_s4 + $0x80] sm:$0xff]  }
  0x11   : > { %2330 = vmatpush3.bf16.msra.mxu0 %v2651_v5  ;;  %2283 = vmatprep.subr.bf16.mxu1 %v2531_v6  ;;  %v2032_v11 = vld [vmem:[%s2681_s28] sm:$0xff]   ;;  %v2175_v16 = vld [vmem:[%s2681_s28 + $0x8] sm:$0xff]   ;;  %v2176_v23 = vld [vmem:[%s2681_s28 + $0x10] sm:$0xff]   ;;  %s3097_s7 = scalar_lea.vmem %s3139_s5, %s1997_s17  ;;  %s329_s9 = scalar_lea.vmem %s3140_s6, %s1901_s11 }
  0x12   : > { %2331 = vmatprep.subr.bf16.mxu0 %v2663_v7  ;;  %v2033_v14 = vunpack.c.l.bf16 %v2032_v11  ;;  %v2034_v15 = vunpack.c.h.bf16 %v2032_v11  ;;  %v2037_v18 = vunpack.c.l.bf16 %v2175_v16  ;;  %v2038_v19 = vunpack.c.h.bf16 %v2175_v16  ;;  %v2177_v28 = vld [vmem:[%s2681_s28 + $0x18] sm:$0xff]   ;;  %v2742_v42 = vld [vmem:[%s313_s25] sm:$0x3]  ;;  %v2179_v62 = vld [vmem:[%s2681_s28 + $0x28] sm:$0xff]  }
  0x13   : > { %v2041_v26 = vunpack.c.l.bf16 %v2176_v23  ;;  %v2042_v27 = vunpack.c.h.bf16 %v2176_v23  ;;  %v2045_v32 = vunpack.c.l.bf16 %v2177_v28  ;;  %v2046_v33 = vunpack.c.h.bf16 %v2177_v28  ;;  %v2178_v50 = vld [vmem:[%s2681_s28 + $0x20] sm:$0xff]  }
  0x14   : > { %2284 = vmatpush3.bf16.msra.mxu1 %v2531_v6  ;;  %v403_v21 = vmul.f32 %v2033_v14, %v2691_v12  ;;  %v404_v22 = vmul.f32 %v2034_v15, %v2691_v12  ;;  %v405_v24 = vmul.f32 %v2037_v18, %v2691_v12  ;;  %v406_v25 = vmul.f32 %v2038_v19, %v2691_v12 }
  0x15   : > { %2332 = vmatpush3.bf16.msra.mxu0 %v2663_v7  ;;  %2285 = vmatprep.subr.bf16.mxu1 %v2533_v8  ;;  %v407_v37 = vmul.f32 %v2041_v26, %v2691_v12  ;;  %v408_v38 = vmul.f32 %v2042_v27, %v2691_v12  ;;  %v409_v41 = vmul.f32 %v2045_v32, %v2691_v12  ;;  %v2049_v61 = vunpack.c.l.bf16 %v2178_v50 }
  0x16   : > { %2333 = vmatprep.subr.bf16.mxu0 %v2674_v9  ;;  %v442_v30 = vadd.f32 %v2704_v17, %v403_v21  ;;  %v443_v31 = vadd.f32 %v2704_v17, %v404_v22  ;;  %v444_v35 = vadd.f32 %v2704_v17, %v405_v24  ;;  %v445_v36 = vadd.f32 %v2704_v17, %v406_v25  ;;  %v2180_v24 = vld [vmem:[%s2681_s28 + $0x30] sm:$0xff]   ;;  %v2542_v25 = vld [vmem:[%s3138_s4 + $0x88] sm:$0xff]  }
  0x17   : > { %v446_v45 = vadd.f32 %v2704_v17, %v407_v37  ;;  %v447_v46 = vadd.f32 %v2704_v17, %v408_v38  ;;  %v410_v53 = vmul.f32 %v2046_v33, %v2691_v12  ;;  %v448_v60 = vadd.f32 %v2704_v17, %v409_v41  ;;  %v2181_v41 = vld [vmem:[%s2681_s28 + $0x38] sm:$0xff]  }
  0x18   : > { %2286 = vmatpush3.bf16.msra.mxu1 %v2533_v8  ;;  %v2736_v39 = vmax.f32 %v442_v30, 0.0  ;;  %v2738_v40 = vmax.f32 %v443_v31, 0.0  ;;  %v2744_v43 = vmax.f32 %v444_v35, 0.0  ;;  %v2746_v44 = vmax.f32 %v445_v36, 0.0 }
  0x19   : > { %2334 = vmatpush3.bf16.msra.mxu0 %v2674_v9  ;;  %2287 = vmatprep.subr.bf16.mxu1 %v2535_v10  ;;  %v2766_v56 = vmax.f32 %v446_v45, 0.0  ;;  %v2768_v57 = vmax.f32 %v447_v46, 0.0  ;;  %v449_v14 = vadd.f32 %v2704_v17, %v410_v53  ;;  %v2787_v15 = vmax.f32 %v448_v60, 0.0 }
  0x1a   : > { %2335 = vmatprep.subr.bf16.mxu0 %v2697_v13  ;;  %v768_v48 = vpack.c.bf16 %v2738_v40, %v2736_v39  ;;  %v540_v49 = vrot.slane %v2736_v39, 7  ;;  %v541_v51 = vrot.slane %v2738_v40, 7  ;;  %v543_v52 = vrot.slane %v2744_v43, 7 }
  0x1b   : > { %v545_v55 = vrot.slane %v2746_v44, 7  ;;  %v769_v0 = vpack.c.bf16 %v2746_v44, %v2744_v43  ;;  %v770_v6 = vpack.c.bf16 %v2768_v57, %v2766_v56  ;;  %v549_v11 = vrot.slane %v2768_v57, 7 }
  0x1c   : > { %2288 = vmatpush3.bf16.msra.mxu1 %v2535_v10  ;;  %2293 = vmatprep.mubr.bf16.mxu1 %v768_v48  ;;  %v635_v54 = vsel %vm539_vm0, %v2742_v42, %v540_v49  ;;  %v542_v58 = vsel %vm539_vm0, %v540_v49, %v541_v51  ;;  %v544_v59 = vsel %vm539_vm0, %v541_v51, %v543_v52  ;;  %v547_v10 = vrot.slane %v2766_v56, 7 }
  0x1d   : > { %2336 = vmatpush3.bf16.msra.mxu0 %v2697_v13  ;;  %2289 = vmatprep.subr.bf16.mxu1 %v2537_v20  ;;  %v736_v63 = vpack.c.bf16 %v542_v58, %v635_v54  ;;  %v546_v2 = vsel %vm539_vm0, %v543_v52, %v545_v55  ;;  %v2050_v16 = vunpack.c.h.bf16 %v2178_v50  ;;  %v411_v18 = vmul.f32 %v2049_v61, %v2691_v12  ;;  %v2543_v50 = vld [vmem:[%s3138_s4 + $0x90] sm:$0xff]  }
  0x1e   : > { %2337 = vmatprep.subr.bf16.mxu0 %v2720_v29  ;;  %v737_v8 = vpack.c.bf16 %v546_v2, %v544_v59  ;;  %v2053_v19 = vunpack.c.l.bf16 %v2179_v62  ;;  %v550_v21 = vsel %vm539_vm0, %v547_v10, %v549_v11  ;;  %v2794_v22 = vmax.f32 %v449_v14, 0.0  ;;  %v2182_v14 = vld [vmem:[%s2681_s28 + $0x40] sm:$0xff]  }
  0x1f   : > { %2341 = vmatprep.mubr.bf16.mxu0 %v736_v63  ;;  %v2054_v23 = vunpack.c.h.bf16 %v2179_v62  ;;  %v551_v27 = vrot.slane %v2787_v15, 7  ;;  %v412_v28 = vmul.f32 %v2050_v16, %v2691_v12  ;;  %v450_v30 = vadd.f32 %v2704_v17, %v411_v18 }
  0x20   : > { %2290 = vmatpush3.bf16.msra.mxu1 %v2537_v20  ;;  %v548_v20 = vsel %vm539_vm0, %v545_v55, %v547_v10  ;;  %v771_v31 = vpack.c.bf16 %v2794_v22, %v2787_v15  ;;  %v553_v32 = vrot.slane %v2794_v22, 7  ;;  %v413_v33 = vmul.f32 %v2053_v19, %v2691_v12 }
  0x21   : > { %2338 = vmatpush3.bf16.msra.mxu0 %v2720_v29  ;;  %2291 = vmatprep.subr.bf16.mxu1 %v2539_v34  ;;  %v738_v26 = vpack.c.bf16 %v550_v21, %v548_v20  ;;  %v552_v35 = vsel %vm539_vm0, %v549_v11, %v551_v27  ;;  %v451_v36 = vadd.f32 %v2704_v17, %v412_v28  ;;  %v2811_v37 = vmax.f32 %v450_v30, 0.0 }
  0x22   : > { %2339 = vmatprep.subr.bf16.mxu0 %v2754_v47  ;;  %v2057_v38 = vunpack.c.l.bf16 %v2180_v24  ;;  %v554_v45 = vsel %vm539_vm0, %v551_v27, %v553_v32  ;;  %v452_v46 = vadd.f32 %v2704_v17, %v413_v33  ;;  %v2058_v49 = vunpack.c.h.bf16 %v2180_v24 }
  0x23   : > { %v2820_v51 = vmax.f32 %v451_v36, 0.0  ;;  %v555_v52 = vrot.slane %v2811_v37, 7  ;;  %v2061_v59 = vunpack.c.l.bf16 %v2181_v41  ;;  %v2062_v11 = vunpack.c.h.bf16 %v2181_v41 }
  0x24   : > { %2292 = vmatpush3.bf16.msra.mxu1 %v2539_v34  ;;  %v414_v34 = vmul.f32 %v2054_v23, %v2691_v12  ;;  %v415_v53 = vmul.f32 %v2057_v38, %v2691_v12  ;;  %v2825_v54 = vmax.f32 %v452_v46, 0.0  ;;  %v416_v58 = vmul.f32 %v2058_v49, %v2691_v12 }
  0x25   : > { %2340 = vmatpush3.bf16.msra.mxu0 %v2754_v47  ;;  %2421 = vmatprep.subr.bf16.mxu1 %v2632_v1  ;;  %v772_v60 = vpack.c.bf16 %v2820_v51, %v2811_v37  ;;  %v556_v61 = vsel %vm539_vm0, %v553_v32, %v555_v52  ;;  %v557_v62 = vrot.slane %v2820_v51, 7  ;;  %v638_v21 = vrot.slane %v2738_v40, 1  ;;  %v2545_v32 = vld [vmem:[%s3138_s4 + $0xa0] sm:$0xff]  }
  0x26   : > { %2373 = vmatprep.subr.bf16.mxu0 %v2541_v4  ;;  %v453_v48 = vadd.f32 %v2704_v17, %v414_v34  ;;  %v454_v63 = vadd.f32 %v2704_v17, %v415_v53  ;;  %v559_v2 = vrot.slane %v2825_v54, 7  ;;  %v418_v24 = vmul.f32 %v2062_v11, %v2691_v12 }
  0x27   : > { %2294 = vmatmul.mubr.bf16.vlgmr.msra.gmra.mrb[0].mxu1 %v769_v0  ;;  %v637_v0 = vrot.slane %v2736_v39, 1  ;;  %v417_v39 = vmul.f32 %v2061_v59, %v2691_v12  ;;  %v2065_v28 = vunpack.c.l.bf16 %v2182_v14  ;;  %v2066_v30 = vunpack.c.h.bf16 %v2182_v14 }
  0x28   : > { %2342 = vmatmul.mubr.bf16.vlgmr.msra.gmra.mrb[0].mxu0 %v737_v8  ;;  %2429 = vmatpush3.bf16.msra.mxu1 %v2632_v1  ;;  %v739_v1 = vpack.c.bf16 %v554_v45, %v552_v35  ;;  %v2827_v55 = vmax.f32 %v453_v48, 0.0  ;;  %v558_v8 = vsel %vm539_vm0, %v555_v52, %v557_v62  ;;  %v2845_v10 = vmax.f32 %v454_v63, 0.0 }
  0x29   : > { %2374 = vmatpush3.bf16.msra.mxu0 %v2541_v4  ;;  %2297 = vmatprep.mubr.bf16.mxu1 %v770_v6  ;;  %v2544_v6 = vld [vmem:[%s3138_s4 + $0x98] sm:$0xff]   ;;  %v740_v16 = vpack.c.bf16 %v558_v8, %v556_v61  ;;  %v560_v18 = vsel %vm539_vm0, %v557_v62, %v559_v2  ;;  %v457_v34 = vadd.f32 %v2704_v17, %v418_v24  ;;  %v640_v45 = vrot.slane %v2744_v43, 1  ;;  %v2546_v43 = vld [vmem:[%s3138_s4 + $0xa8] sm:$0xff]  }
  0x2a   : > { %2375 = vmatprep.subr.bf16.mxu0 %v2542_v25  ;;  %2345 = vmatprep.mubr.bf16.mxu0 %v738_v26  ;;  %v561_v4 = vrot.slane %v2827_v55, 7  ;;  %v563_v23 = vrot.slane %v2845_v10, 7  ;;  %v773_v26 = vpack.c.bf16 %v2827_v55, %v2825_v54  ;;  %v419_v38 = vmul.f32 %v2065_v28, %v2691_v12 }
  0x2b   : > { %2422 = vmatprep.subr.bf16.mxu1 %v2641_v3  ;;  %v420_v41 = vmul.f32 %v2066_v30, %v2691_v12  ;;  %v2876_v48 = vmax.f32 %v457_v34, 0.0  ;;  %v641_v61 = vsel %vm636_vm1, %v638_v21, %v640_v45  ;;  %v646_v28 = vrot.slane %v2768_v57, 1 }
  0x2c   : > { %2430 = vmatpush3.bf16.msra.mxu1 %v2641_v3  ;;  %v455_v3 = vadd.f32 %v2704_v17, %v416_v58  ;;  %v562_v19 = vsel %vm539_vm0, %v559_v2, %v561_v4  ;;  %v564_v33 = vsel %vm539_vm0, %v561_v4, %v563_v23  ;;  %v2184_v58 = vld [vmem:[%s2681_s28 + $0x50] sm:$0xff]   ;;  %v648_v30 = vrot.slane %v2787_v15, 1 }
  0x2d   : > { %2376 = vmatpush3.bf16.msra.mxu0 %v2542_v25  ;;  %2423 = vmatprep.subr.bf16.mxu1 %v2651_v5  ;;  %v456_v25 = vadd.f32 %v2704_v17, %v417_v39  ;;  %v741_v40 = vpack.c.bf16 %v562_v19, %v560_v18  ;;  %v459_v52 = vadd.f32 %v2704_v17, %v420_v41  ;;  %v569_v59 = vrot.slane %v2876_v48, 7 }
  0x2e   : > { %2377 = vmatprep.subr.bf16.mxu0 %v2543_v50  ;;  %v2851_v20 = vmax.f32 %v455_v3, 0.0  ;;  %v2073_v3 = vunpack.c.l.bf16 %v2184_v58  ;;  %v2074_v11 = vunpack.c.h.bf16 %v2184_v58  ;;  %v644_v39 = vrot.slane %v2766_v56, 1 }
  0x2f   : > { %2298 = vmatmul.mubr.bf16.gmra.mrb[4].mxu1 %v771_v31  ;;  %v2183_v31 = vld [vmem:[%s2681_s28 + $0x48] sm:$0xff]   ;;  %v2867_v35 = vmax.f32 %v456_v25, 0.0  ;;  %v2894_v4 = vmax.f32 %v459_v52, 0.0 }
  0x30   : > { %2346 = vmatmul.mubr.bf16.gmra.mrb[4].mxu0 %v739_v1  ;;  %2301 = vmatprep.mubr.bf16.mxu1 %v772_v60  ;;  %v565_v27 = vrot.slane %v2851_v20, 7  ;;  %v2069_v49 = vunpack.c.l.bf16 %v2183_v31  ;;  %v2070_v53 = vunpack.c.h.bf16 %v2183_v31  ;;  %v639_v60 = vsel %vm636_vm1, %v637_v0, %v638_v21 }
  0x31   : > { %2378 = vmatpush3.bf16.msra.mxu0 %v2543_v50  ;;  %2349 = vmatprep.mubr.bf16.mxu0 %v740_v16  ;;  %v567_v1 = vrot.slane %v2867_v35, 7  ;;  %v458_v50 = vadd.f32 %v2704_v17, %v419_v38  ;;  %v775_v14 = vpack.c.bf16 %v2876_v48, %v2867_v35  ;;  %v2547_v16 = vld [vmem:[%s3138_s4 + $0xb0] sm:$0xff]   ;;  %v423_v18 = vmul.f32 %v2073_v3, %v2691_v12 }
  0x32   : > { %2379 = vmatprep.subr.bf16.mxu0 %v2544_v6  ;;  %2431 = vmatpush3.bf16.msra.mxu1 %v2651_v5  ;;  %v566_v36 = vsel %vm539_vm0, %v563_v23, %v565_v27  ;;  %v774_v5 = vpack.c.bf16 %v2851_v20, %v2845_v10  ;;  %v421_v62 = vmul.f32 %v2069_v49, %v2691_v12 }
  0x33   : > { %2424 = vmatprep.subr.bf16.mxu1 %v2663_v7  ;;  %v742_v46 = vpack.c.bf16 %v566_v36, %v564_v33  ;;  %v422_v63 = vmul.f32 %v2070_v53, %v2691_v12  ;;  %v2892_v2 = vmax.f32 %v458_v50, 0.0  ;;  %v568_v0 = vsel %vm539_vm0, %v565_v27, %v567_v1 }
  0x34   : > { %v570_v8 = vsel %vm539_vm0, %v567_v1, %v569_v59  ;;  %v460_v19 = vadd.f32 %v2704_v17, %v421_v62  ;;  %v424_v56 = vmul.f32 %v2074_v11, %v2691_v12  ;;  %v649_v49 = vsel %vm636_vm1, %v646_v28, %v648_v30 }
  0x35   : > { %2380 = vmatpush3.bf16.msra.mxu0 %v2544_v6  ;;  %v2185_v6 = vld [vmem:[%s2681_s28 + $0x58] sm:$0xff]   ;;  %v461_v21 = vadd.f32 %v2704_v17, %v422_v63  ;;  %v743_v24 = vpack.c.bf16 %v570_v8, %v568_v0  ;;  %v776_v25 = vpack.c.bf16 %v2894_v4, %v2892_v2  ;;  %v650_v50 = vrot.slane %v2794_v22, 1 }
  0x36   : > { %2381 = vmatprep.subr.bf16.mxu0 %v2545_v32  ;;  %2432 = vmatpush3.bf16.msra.mxu1 %v2663_v7  ;;  %v642_v7 = vrot.slane %v2746_v44, 1  ;;  %v1219_v44 = vpack.c.bf16 %v641_v61, %v639_v60  ;;  %v2077_v23 = vunpack.c.l.bf16 %v2185_v6  ;;  %v2078_v27 = vunpack.c.h.bf16 %v2185_v6 }
  0x37   : > { %2302 = vmatmul.mubr.bf16.gmra.mrb[8].mxu1 %v773_v26  ;;  %2425 = vmatprep.subr.bf16.mxu1 %v2674_v9  ;;  %v462_v26 = vadd.f32 %v2704_v17, %v423_v18  ;;  %v2927_v34 = vmax.f32 %v460_v19, 0.0  ;;  %v2929_v36 = vmax.f32 %v461_v21, 0.0  ;;  %v652_v53 = vrot.slane %v2811_v37, 1  ;;  %v2188_v37 = vld [vmem:[%s2681_s28 + $0x70] sm:$0xff]  }
  0x38   : > { %2350 = vmatmul.mubr.bf16.gmra.mrb[8].mxu0 %v741_v40  ;;  %2305 = vmatprep.mubr.bf16.mxu1 %v774_v5  ;;  %v425_v31 = vmul.f32 %v2077_v23, %v2691_v12  ;;  %v2186_v40 = vld [vmem:[%s2681_s28 + $0x60] sm:$0xff]   ;;  %v643_v33 = vsel %vm636_vm1, %v640_v45, %v642_v7  ;;  %v645_v57 = vsel %vm636_vm1, %v642_v7, %v644_v39  ;;  %v654_v8 = vrot.slane %v2820_v51, 1 }
  0x39   : > { %2382 = vmatpush3.bf16.msra.mxu0 %v2545_v32  ;;  %2353 = vmatprep.mubr.bf16.mxu0 %v742_v46  ;;  %v2548_v32 = vld [vmem:[%s3138_s4 + $0xb8] sm:$0xff]   ;;  %v426_v15 = vmul.f32 %v2078_v27, %v2691_v12  ;;  %v2934_v38 = vmax.f32 %v462_v26, 0.0  ;;  %v2081_v45 = vunpack.c.l.bf16 %v2186_v40  ;;  %v2082_v5 = vunpack.c.h.bf16 %v2186_v40 }
  0x3a   : > { %2383 = vmatprep.subr.bf16.mxu0 %v2546_v43  ;;  %2433 = vmatpush3.bf16.msra.mxu1 %v2674_v9  ;;  %v463_v9 = vadd.f32 %v2704_v17, %v424_v56  ;;  %v647_v46 = vsel %vm636_vm1, %v644_v39, %v646_v28  ;;  %v464_v1 = vadd.f32 %v2704_v17, %v425_v31  ;;  %v2089_v18 = vunpack.c.l.bf16 %v2188_v37  ;;  %v2189_v56 = vld [vmem:[%s2681_s28 + $0x78] sm:$0xff]  }
  0x3b   : > { %2426 = vmatprep.subr.bf16.mxu1 %v2697_v13  ;;  %v465_v52 = vadd.f32 %v2704_v17, %v426_v15  ;;  %v427_v58 = vmul.f32 %v2081_v45, %v2691_v12  ;;  %v777_v60 = vpack.c.bf16 %v2929_v36, %v2927_v34  ;;  %v1220_v61 = vpack.c.bf16 %v645_v57, %v643_v33 }
  0x3c   : > { %v2936_v41 = vmax.f32 %v463_v9, 0.0  ;;  %v1221_v7 = vpack.c.bf16 %v649_v49, %v647_v46  ;;  %v2956_v0 = vmax.f32 %v464_v1, 0.0  ;;  %v653_v39 = vsel %vm636_vm1, %v650_v50, %v652_v53 }
  0x3d   : > { %2384 = vmatpush3.bf16.msra.mxu0 %v2546_v43  ;;  %v428_v43 = vmul.f32 %v2082_v5, %v2691_v12  ;;  %v466_v22 = vadd.f32 %v2704_v17, %v427_v58  ;;  %v2959_v11 = vmax.f32 %v465_v52, 0.0  ;;  %v2090_v51 = vunpack.c.h.bf16 %v2188_v37 }
  0x3e   : > { %2385 = vmatprep.subr.bf16.mxu0 %v2547_v16  ;;  %2434 = vmatpush3.bf16.msra.mxu1 %v2697_v13  ;;  %v2187_v13 = vld [vmem:[%s2681_s28 + $0x68] sm:$0xff]   ;;  %v778_v63 = vpack.c.bf16 %v2936_v41, %v2934_v38  ;;  %v658_v27 = vrot.slane %v2827_v55, 1  ;;  %v2093_v31 = vunpack.c.l.bf16 %v2189_v56  ;;  %v2094_v40 = vunpack.c.h.bf16 %v2189_v56 }
  0x3f   : > { %2306 = vmatmul.mubr.bf16.gmra.mrb[12].mxu1 %v775_v14  ;;  %2427 = vmatprep.subr.bf16.mxu1 %v2720_v29  ;;  %v2085_v62 = vunpack.c.l.bf16 %v2187_v13  ;;  %v467_v3 = vadd.f32 %v2704_v17, %v428_v43  ;;  %v2086_v6 = vunpack.c.h.bf16 %v2187_v13  ;;  %v656_v14 = vrot.slane %v2825_v54, 1 }
  0x40   : > { %2354 = vmatmul.mubr.bf16.gmra.mrb[12].mxu0 %v743_v24  ;;  %2309 = vmatprep.mubr.bf16.mxu1 %v776_v25  ;;  %v2966_v19 = vmax.f32 %v466_v22, 0.0  ;;  %v655_v24 = vsel %vm636_vm1, %v652_v53, %v654_v8  ;;  %v431_v54 = vmul.f32 %v2089_v18, %v2691_v12  ;;  %v779_v25 = vpack.c.bf16 %v2959_v11, %v2956_v0 }
  0x41   : > { %2386 = vmatpush3.bf16.msra.mxu0 %v2547_v16  ;;  %2389 = vmatprep.mubr.bf16.mxu0 %v1219_v44  ;;  %v429_v16 = vmul.f32 %v2085_v62, %v2691_v12  ;;  %v430_v44 = vmul.f32 %v2086_v6, %v2691_v12  ;;  %v2968_v21 = vmax.f32 %v467_v3, 0.0  ;;  %v657_v26 = vsel %vm636_vm1, %v654_v8, %v656_v14 }
  0x42   : > { %2387 = vmatprep.subr.bf16.mxu0 %v2548_v32  ;;  %2435 = vmatpush3.bf16.msra.mxu1 %v2720_v29  ;;  %v651_v29 = vsel %vm636_vm1, %v648_v30, %v650_v50  ;;  %v432_v9 = vmul.f32 %v2090_v51, %v2691_v12  ;;  %v470_v33 = vadd.f32 %v2704_v17, %v431_v54  ;;  %v662_v55 = vrot.slane %v2851_v20, 1 }
  0x43   : > { %2428 = vmatprep.subr.bf16.mxu1 %v2754_v47  ;;  %v1222_v23 = vpack.c.bf16 %v653_v39, %v651_v29  ;;  %v468_v28 = vadd.f32 %v2704_v17, %v429_v16  ;;  %v469_v30 = vadd.f32 %v2704_v17, %v430_v44  ;;  %v1223_v15 = vpack.c.bf16 %v657_v26, %v655_v24 }
  0x44   : > { %v471_v57 = vadd.f32 %v2704_v17, %v432_v9  ;;  %v664_v45 = vrot.slane %v2867_v35, 1  ;;  %v433_v46 = vmul.f32 %v2093_v31, %v2691_v12  ;;  %v434_v49 = vmul.f32 %v2094_v40, %v2691_v12 }
  0x45   : > { %2388 = vmatpush3.bf16.msra.mxu0 %v2548_v32  ;;  %v780_v32 = vpack.c.bf16 %v2968_v21, %v2966_v19  ;;  %v2988_v5 = vmax.f32 %v468_v28, 0.0  ;;  %v2990_v13 = vmax.f32 %v469_v30, 0.0  ;;  %v2996_v50 = vmax.f32 %v470_v33, 0.0 }
  0x46   : > { %2436 = vmatpush3.bf16.msra.mxu1 %v2754_v47  ;;  %v660_v47 = vrot.slane %v2845_v10, 1  ;;  %v659_v10 = vsel %vm636_vm1, %v656_v14, %v658_v27  ;;  %v2998_v20 = vmax.f32 %v471_v57, 0.0  ;;  %v665_v52 = vsel %vm636_vm1, %v662_v55, %v664_v45 }
  0x47   : > { %2310 = vmatmul.mubr.bf16.gmra.mrb[16].mxu1 %v777_v60  ;;  %v781_v53 = vpack.c.bf16 %v2990_v13, %v2988_v5  ;;  %v472_v12 = vadd.f32 %v2704_v17, %v433_v46  ;;  %v473_v43 = vadd.f32 %v2704_v17, %v434_v49  ;;  %v666_v62 = vrot.slane %v2876_v48, 1 }
  0x48   : > { %2390 = vmatmul.mubr.bf16.vlgmr.msra.gmra.mrb[0].mxu0 %v1220_v61  ;;  %2313 = vmatprep.mubr.bf16.mxu1 %v778_v63  ;;  %v661_v1 = vsel %vm636_vm1, %v658_v27, %v660_v47  ;;  %v663_v35 = vsel %vm636_vm1, %v660_v47, %v662_v55  ;;  %v782_v60 = vpack.c.bf16 %v2998_v20, %v2996_v50  ;;  %v668_v63 = vrot.slane %v2892_v2, 1 }
  0x49   : > { %2393 = vmatprep.mubr.bf16.mxu0 %v1221_v7  ;;  %v1224_v58 = vpack.c.bf16 %v661_v1, %v659_v10  ;;  %v1225_v61 = vpack.c.bf16 %v665_v52, %v663_v35  ;;  %v571_v22 = vrot.slane %v2892_v2, 7  ;;  %v573_v3 = vrot.slane %v2894_v4, 7 }
  0x4a   : > { %v670_v6 = vrot.slane %v2894_v4, 1  ;;  %v672_v37 = vrot.slane %v2927_v34, 1  ;;  %v3014_v7 = vmax.f32 %v472_v12, 0.0  ;;  %v3016_v17 = vmax.f32 %v473_v43, 0.0 }
  0x4b   : > { %v667_v8 = vsel %vm636_vm1, %v664_v45, %v666_v62  ;;  %v669_v29 = vsel %vm636_vm1, %v666_v62, %v668_v63  ;;  %v572_v2 = vsel %vm539_vm0, %v569_v59, %v571_v22  ;;  %v574_v4 = vsel %vm539_vm0, %v571_v22, %v573_v3 }
  0x4c   : > { %v671_v39 = vsel %vm636_vm1, %v668_v63, %v670_v6  ;;  %v673_v14 = vsel %vm636_vm1, %v670_v6, %v672_v37  ;;  %v575_v16 = vrot.slane %v2927_v34, 7  ;;  %v577_v44 = vrot.slane %v2929_v36, 7 }
  0x4d   : > { %v783_v18 = vpack.c.bf16 %v3016_v17, %v3014_v7  ;;  %v1226_v51 = vpack.c.bf16 %v669_v29, %v667_v8  ;;  %v744_v56 = vpack.c.bf16 %v574_v4, %v572_v2  ;;  %v674_v48 = vrot.slane %v2929_v36, 1 }
  0x4e   : > { %v676_v59 = vrot.slane %v2934_v38, 1  ;;  %v579_v24 = vrot.slane %v2934_v38, 7  ;;  %v581_v54 = vrot.slane %v2936_v41, 7  ;;  %v680_v34 = vrot.slane %v2956_v0, 1 }
  0x4f   : > { %2314 = vmatmul.mubr.bf16.gmra.mrb[20].mxu1 %v779_v25  ;;  %v678_v25 = vrot.slane %v2936_v41, 1  ;;  %v576_v26 = vsel %vm539_vm0, %v573_v3, %v575_v16  ;;  %v578_v27 = vsel %vm539_vm0, %v575_v16, %v577_v44  ;;  %v675_v9 = vsel %vm636_vm1, %v672_v37, %v674_v48 }
  0x50   : > { %2394 = vmatmul.mubr.bf16.gmra.mrb[4].mxu0 %v1222_v23  ;;  %2317 = vmatprep.mubr.bf16.mxu1 %v780_v32  ;;  %v1227_v23 = vpack.c.bf16 %v673_v14, %v671_v39  ;;  %v677_v36 = vsel %vm636_vm1, %v674_v48, %v676_v59  ;;  %v580_v38 = vsel %vm539_vm0, %v577_v44, %v579_v24  ;;  %v583_v32 = vrot.slane %v2956_v0, 7 }
  0x51   : > { %2397 = vmatprep.mubr.bf16.mxu0 %v1223_v15  ;;  %v582_v28 = vsel %vm539_vm0, %v579_v24, %v581_v54  ;;  %v679_v41 = vsel %vm636_vm1, %v676_v59, %v678_v25  ;;  %v681_v30 = vsel %vm636_vm1, %v678_v25, %v680_v34  ;;  %v745_v31 = vpack.c.bf16 %v578_v27, %v576_v26 }
  0x52   : > { %v1228_v40 = vpack.c.bf16 %v677_v36, %v675_v9  ;;  %v585_v47 = vrot.slane %v2959_v11, 7  ;;  %v746_v33 = vpack.c.bf16 %v582_v28, %v580_v38  ;;  %v1229_v57 = vpack.c.bf16 %v681_v30, %v679_v41 }
  0x53   : > { %v682_v15 = vrot.slane %v2959_v11, 1  ;;  %v684_v55 = vrot.slane %v2966_v19, 1  ;;  %v587_v45 = vrot.slane %v2966_v19, 7  ;;  %v589_v46 = vrot.slane %v2968_v21, 7 }
  0x54   : > { %v686_v49 = vrot.slane %v2968_v21, 1  ;;  %v688_v10 = vrot.slane %v2988_v5, 1  ;;  %v584_v1 = vsel %vm539_vm0, %v581_v54, %v583_v32  ;;  %v586_v0 = vsel %vm539_vm0, %v583_v32, %v585_v47 }
  0x55   : > { %v683_v35 = vsel %vm636_vm1, %v680_v34, %v682_v15  ;;  %v685_v11 = vsel %vm636_vm1, %v682_v15, %v684_v55  ;;  %v588_v19 = vsel %vm539_vm0, %v585_v47, %v587_v45  ;;  %v590_v52 = vsel %vm539_vm0, %v587_v45, %v589_v46 }
  0x56   : > { %v687_v21 = vsel %vm636_vm1, %v684_v55, %v686_v49  ;;  %v591_v12 = vrot.slane %v2988_v5, 7  ;;  %v1230_v43 = vpack.c.bf16 %v685_v11, %v683_v35  ;;  %v593_v62 = vrot.slane %v2990_v13, 7 }
  0x57   : > { %2318 = vmatmul.mubr.bf16.gmra.mrb[24].mxu1 %v781_v53  ;;  %v689_v53 = vsel %vm636_vm1, %v686_v49, %v688_v10  ;;  %v690_v63 = vrot.slane %v2990_v13, 1  ;;  %v692_v22 = vrot.slane %v2996_v50, 1  ;;  %v595_v3 = vrot.slane %v2996_v50, 7 }
  0x58   : > { %2398 = vmatmul.mubr.bf16.gmra.mrb[8].mxu0 %v1224_v58  ;;  %2321 = vmatprep.mubr.bf16.mxu1 %v782_v60  ;;  %v747_v58 = vpack.c.bf16 %v586_v0, %v584_v1  ;;  %v748_v60 = vpack.c.bf16 %v590_v52, %v588_v19  ;;  %v597_v6 = vrot.slane %v2998_v20, 7  ;;  %v694_v37 = vrot.slane %v2998_v20, 1 }
  0x59   : > { %2401 = vmatprep.mubr.bf16.mxu0 %v1225_v61  ;;  %v1231_v61 = vpack.c.bf16 %v689_v53, %v687_v21  ;;  %v696_v8 = vrot.slane %v3014_v7, 1  ;;  %v592_v5 = vsel %vm539_vm0, %v589_v46, %v591_v12  ;;  %v594_v29 = vsel %vm539_vm0, %v591_v12, %v593_v62 }
  0x5a   : > { %v691_v13 = vsel %vm636_vm1, %v688_v10, %v690_v63  ;;  %v693_v2 = vsel %vm636_vm1, %v690_v63, %v692_v22  ;;  %v596_v50 = vsel %vm539_vm0, %v593_v62, %v595_v3  ;;  %v598_v4 = vsel %vm539_vm0, %v595_v3, %v597_v6 }
  0x5b   : > { %v695_v20 = vsel %vm636_vm1, %v692_v22, %v694_v37  ;;  %v697_v39 = vsel %vm636_vm1, %v694_v37, %v696_v8  ;;  %v749_v14 = vpack.c.bf16 %v594_v29, %v592_v5  ;;  %v1232_v16 = vpack.c.bf16 %v693_v2, %v691_v13 }
  0x5c   : > { %v750_v44 = vpack.c.bf16 %v598_v4, %v596_v50  ;;  %v698_v48 = vrot.slane %v3016_v17, 1 }
  0x5e   : > { %v699_v54 = vsel %vm636_vm1, %v696_v8, %v698_v48 }
  0x5f   : > { %2322 = vmatmul.mubr.bf16.gmra.mrb[28].mxu1 %v783_v18  ;;  %v599_v18 = vrot.slane %v3014_v7, 7 }
  0x60   : > { %2402 = vmatmul.mubr.bf16.gmra.mrb[12].mxu0 %v1226_v51  ;;  %2357 = vmatprep.mubr.bf16.mxu1 %v744_v56  ;;  %v601_v51 = vrot.slane %v3016_v17, 7  ;;  %v733_v56 = vrot.slane %v2742_v42, 2 }
  0x61   : > { %2405 = vmatprep.mubr.bf16.mxu0 %v1227_v23  ;;  %v1233_v23 = vpack.c.bf16 %v697_v39, %v695_v20  ;;  %v600_v59 = vsel %vm539_vm0, %v597_v6, %v599_v18 }
  0x62   : > { %v602_v24 = vsel %vm539_vm0, %v599_v18, %v601_v51  ;;  %v735_v25 = vsel %vm636_vm1, %v698_v48, %v733_v56 }
  0x63   : > { %v751_v7 = vpack.c.bf16 %v602_v24, %v600_v59  ;;  %v1234_v34 = vpack.c.bf16 %v735_v25, %v699_v54 }
  0x67   : > { %2358 = vmatmul.mubr.bf16.vlgmr.msra.gmra.mrb[16].mxu1 %v745_v31 }
  0x68   : > { %2406 = vmatmul.mubr.bf16.gmra.mrb[16].mxu0 %v1228_v40  ;;  %2361 = vmatprep.mubr.bf16.mxu1 %v746_v33 }
  0x69   : > { %2409 = vmatprep.mubr.bf16.mxu0 %v1229_v57 }
  0x6f   : > { %2362 = vmatmul.mubr.bf16.gmra.mrb[20].mxu1 %v747_v58 }
  0x70   : > { %2410 = vmatmul.mubr.bf16.gmra.mrb[20].mxu0 %v1230_v43  ;;  %2365 = vmatprep.mubr.bf16.mxu1 %v748_v60 }
  0x71   : > { %2413 = vmatprep.mubr.bf16.mxu0 %v1231_v61 }
  0x77   : > { %2366 = vmatmul.mubr.bf16.gmra.mrb[24].mxu1 %v749_v14 }
  0x78   : > { %2414 = vmatmul.mubr.bf16.gmra.mrb[24].mxu0 %v1232_v16  ;;  %2369 = vmatprep.mubr.bf16.mxu1 %v750_v44 }
  0x79   : > { %2417 = vmatprep.mubr.bf16.mxu0 %v1233_v23 }
  0x7f   : > { %2370 = vmatmul.mubr.bf16.gmra.mrb[28].mxu1 %v751_v7 }
  0x80   : > { %2418 = vmatmul.mubr.bf16.gmra.mrb[28].mxu0 %v1234_v34 }
  0xfa   : > { %v2295_v42 = vpop.f32.mrb[0].mxu1 }
  0xfb   : > { %v883_v26 = vpop.f32.mrb[1].mxu1 }
  0xfc   : > { %v2296_v27 = vpop.f32.mrb[2].mxu1 }
  0xfd   : > { %v886_v17 = vpop.f32.mrb[3].mxu1 }
 0x102   : > { %v2299_v9 = vpop.f32.mrb[4].mxu1 }
 0x103   : > { %v899_v36 = vpop.f32.mrb[5].mxu1 }
 0x104   : > { %v2300_v38 = vpop.f32.mrb[6].mxu1 }
 0x105   : > { %v902_v28 = vpop.f32.mrb[7].mxu1 }
 0x10a   : > { %v2303_v41 = vpop.f32.mrb[8].mxu1 }
 0x10b   : > { %v915_v30 = vpop.f32.mrb[9].mxu1 }
 0x10c   : > { %v2304_v31 = vpop.f32.mrb[10].mxu1 }
 0x10d   : > { %v918_v40 = vpop.f32.mrb[11].mxu1 }
 0x112   : > { %v3084_v32 = vpop.f32.mrb[12].mxu1 }
 0x113   : > { %v3086_v47 = vpop.f32.mrb[13].mxu1 }
 0x114   : > { %v3088_v33 = vpop.f32.mrb[14].mxu1 }
 0x115   : > { %v3090_v57 = vpop.f32.mrb[15].mxu1 }
 0x11b   : > { %v2391_v15 = vpop.f32.mrb[0].mxu0 }
 0x11c   : > { %v2437_v55 = vadd.f32 %v2391_v15, %v2295_v42  ;;  %v1334_v45 = vpop.f32.mrb[1].mxu0 }
 0x11d   : > { %v2438_v46 = vadd.f32 %v1334_v45, %v883_v26  ;;  %v2392_v49 = vpop.f32.mrb[2].mxu0 }
 0x11e   : > { %v2439_v10 = vadd.f32 %v2392_v49, %v2296_v27  ;;  %v1337_v1 = vpop.f32.mrb[3].mxu0  ;;  %v1532_v53 = vmul.f32 %v2437_v55, %v2437_v55 }
 0x11f   : > { %v2440_v0 = vadd.f32 %v1337_v1, %v886_v17  ;;  %v1530_v11 = vmul.f32 %v2438_v46, %v2438_v46 }
 0x120   : > { %v2103_v35 = vpack.c.bf16 %v2439_v10, %v2437_v55  ;;  %v1533_v62 = vmul.f32 %v2439_v10, %v2439_v10 }
 0x121   : > { %v1493_v19 = vadd.f32 %v2440_v0, %v2438_v46  ;;  %v1531_v52 = vmul.f32 %v2440_v0, %v2440_v0  ;;  %v2098_v21 = vpack.c.bf16 %v2440_v0, %v2438_v46 }
 0x122   : > { %2190 = vst [vmem:[%s3097_s7 + $0x8] sm:$0xff] %v2103_v35  }
 0x123   : > { %v1494_v58 = vadd.f32 %v2437_v55, %v1493_v19  ;;  %v1562_v12 = vadd.f32 %v1531_v52, %v1530_v11  ;;  %2099 = vst [vmem:[%s3097_s7] sm:$0xff] %v2098_v21   ;;  %v2395_v43 = vpop.f32.mrb[4].mxu0 }
 0x124   : > { %v2441_v60 = vadd.f32 %v2395_v43, %v2299_v9  ;;  %v1350_v61 = vpop.f32.mrb[5].mxu0 }
 0x125   : > { %v1563_v63 = vadd.f32 %v1562_v12, %v1532_v53  ;;  %v2442_v22 = vadd.f32 %v1350_v61, %v899_v36  ;;  %v1495_v3 = vadd.f32 %v2439_v10, %v1494_v58  ;;  %v2396_v6 = vpop.f32.mrb[6].mxu0 }
 0x126   : > { %v2443_v37 = vadd.f32 %v2396_v6, %v2300_v38  ;;  %v1353_v8 = vpop.f32.mrb[7].mxu0  ;;  %v1536_v16 = vmul.f32 %v2441_v60, %v2441_v60 }
 0x127   : > { %v1496_v5 = vadd.f32 %v2442_v22, %v1495_v3  ;;  %v1534_v29 = vmul.f32 %v2442_v22, %v2442_v22  ;;  %v1564_v13 = vadd.f32 %v1563_v63, %v1533_v62  ;;  %v2444_v2 = vadd.f32 %v1353_v8, %v902_v28 }
 0x128   : > { %v2113_v50 = vpack.c.bf16 %v2443_v37, %v2441_v60  ;;  %v1537_v48 = vmul.f32 %v2443_v37, %v2443_v37 }
 0x129   : > { %v1565_v4 = vadd.f32 %v1564_v13, %v1534_v29  ;;  %v1497_v20 = vadd.f32 %v2444_v2, %v1496_v5  ;;  %v1535_v39 = vmul.f32 %v2444_v2, %v2444_v2  ;;  %v2108_v14 = vpack.c.bf16 %v2444_v2, %v2442_v22 }
 0x12a   : > { %2192 = vst [vmem:[%s3097_s7 + $0x18] sm:$0xff] %v2113_v50  }
 0x12b   : > { %v1498_v44 = vadd.f32 %v2441_v60, %v1497_v20  ;;  %v1566_v18 = vadd.f32 %v1565_v4, %v1535_v39  ;;  %2191 = vst [vmem:[%s3097_s7 + $0x10] sm:$0xff] %v2108_v14   ;;  %v2399_v51 = vpop.f32.mrb[8].mxu0 }
 0x12c   : > { %v2445_v56 = vadd.f32 %v2399_v51, %v2303_v41  ;;  %v1366_v23 = vpop.f32.mrb[9].mxu0 }
 0x12d   : > { %v1567_v59 = vadd.f32 %v1566_v18, %v1536_v16  ;;  %v2446_v24 = vadd.f32 %v1366_v23, %v915_v30  ;;  %v1499_v54 = vadd.f32 %v2443_v37, %v1498_v44  ;;  %v2400_v25 = vpop.f32.mrb[10].mxu0 }
 0x12e   : > { %v2447_v7 = vadd.f32 %v2400_v25, %v2304_v31  ;;  %v1369_v34 = vpop.f32.mrb[11].mxu0  ;;  %v1540_v41 = vmul.f32 %v2445_v56, %v2445_v56 }
 0x12f   : > { %v1500_v42 = vadd.f32 %v2446_v24, %v1499_v54  ;;  %v1538_v26 = vmul.f32 %v2446_v24, %v2446_v24  ;;  %v1568_v27 = vadd.f32 %v1567_v59, %v1537_v48  ;;  %v2448_v17 = vadd.f32 %v1369_v34, %v918_v40 }
 0x130   : > { %v2123_v9 = vpack.c.bf16 %v2447_v7, %v2445_v56  ;;  %v1541_v31 = vmul.f32 %v2447_v7, %v2447_v7 }
 0x131   : > { %v1569_v36 = vadd.f32 %v1568_v27, %v1538_v26  ;;  %v1501_v38 = vadd.f32 %v2448_v17, %v1500_v42  ;;  %v1539_v28 = vmul.f32 %v2448_v17, %v2448_v17  ;;  %v2118_v15 = vpack.c.bf16 %v2448_v17, %v2446_v24 }
 0x132   : > { %2194 = vst [vmem:[%s3097_s7 + $0x28] sm:$0xff] %v2123_v9  }
 0x133   : > { %v1502_v55 = vadd.f32 %v2445_v56, %v1501_v38  ;;  %v1570_v45 = vadd.f32 %v1569_v36, %v1539_v28  ;;  %2193 = vst [vmem:[%s3097_s7 + $0x20] sm:$0xff] %v2118_v15   ;;  %v2403_v30 = vpop.f32.mrb[12].mxu0 }
 0x134   : > { %v2449_v46 = vadd.f32 %v2403_v30, %v3084_v32  ;;  %v1382_v49 = vpop.f32.mrb[13].mxu0 }
 0x135   : > { %v1571_v10 = vadd.f32 %v1570_v45, %v1540_v41  ;;  %v2450_v1 = vadd.f32 %v1382_v49, %v3086_v47  ;;  %v1503_v40 = vadd.f32 %v2447_v7, %v1502_v55  ;;  %v2404_v0 = vpop.f32.mrb[14].mxu0 }
 0x136   : > { %v2451_v35 = vadd.f32 %v2404_v0, %v3088_v33  ;;  %v1385_v11 = vpop.f32.mrb[15].mxu0  ;;  %v1544_v62 = vmul.f32 %v2449_v46, %v2449_v46 }
 0x137   : > { %v1504_v19 = vadd.f32 %v2450_v1, %v1503_v40  ;;  %v1542_v52 = vmul.f32 %v2450_v1, %v2450_v1  ;;  %v1572_v21 = vadd.f32 %v1571_v10, %v1541_v31  ;;  %v2452_v53 = vadd.f32 %v1385_v11, %v3090_v57 }
 0x138   : > { %v2133_v58 = vpack.c.bf16 %v2451_v35, %v2449_v46  ;;  %v1545_v8 = vmul.f32 %v2451_v35, %v2451_v35 }
 0x139   : > { %v1573_v12 = vadd.f32 %v1572_v21, %v1542_v52  ;;  %v1505_v32 = vadd.f32 %v2452_v53, %v1504_v19  ;;  %v1543_v43 = vmul.f32 %v2452_v53, %v2452_v53  ;;  %v2128_v60 = vpack.c.bf16 %v2452_v53, %v2450_v1 }
 0x13a   : > { %2196 = vst [vmem:[%s3097_s7 + $0x38] sm:$0xff] %v2133_v58   ;;  %v2359_v61 = vpop.f32.mrb[16].mxu1 }
 0x13b   : > { %v1506_v47 = vadd.f32 %v2449_v46, %v1505_v32  ;;  %v1574_v63 = vadd.f32 %v1573_v12, %v1543_v43  ;;  %2195 = vst [vmem:[%s3097_s7 + $0x30] sm:$0xff] %v2128_v60   ;;  %v2407_v22 = vpop.f32.mrb[16].mxu0  ;;  %v1156_v33 = vpop.f32.mrb[17].mxu1 }
 0x13c   : > { %v2453_v3 = vadd.f32 %v2407_v22, %v2359_v61  ;;  %v1398_v6 = vpop.f32.mrb[17].mxu0  ;;  %v2360_v37 = vpop.f32.mrb[18].mxu1 }
 0x13d   : > { %v1575_v5 = vadd.f32 %v1574_v63, %v1544_v62  ;;  %v2454_v57 = vadd.f32 %v1398_v6, %v1156_v33  ;;  %v1507_v29 = vadd.f32 %v2451_v35, %v1506_v47  ;;  %v2408_v13 = vpop.f32.mrb[18].mxu0  ;;  %v1159_v2 = vpop.f32.mrb[19].mxu1 }
 0x13e   : > { %v2455_v50 = vadd.f32 %v2408_v13, %v2360_v37  ;;  %v1401_v4 = vpop.f32.mrb[19].mxu0  ;;  %v1548_v59 = vmul.f32 %v2453_v3, %v2453_v3 }
 0x13f   : > { %v1508_v20 = vadd.f32 %v2454_v57, %v1507_v29  ;;  %v1546_v39 = vmul.f32 %v2454_v57, %v2454_v57  ;;  %v1576_v14 = vadd.f32 %v1575_v5, %v1545_v8  ;;  %v2456_v16 = vadd.f32 %v1401_v4, %v1159_v2 }
 0x140   : > { %v2143_v44 = vpack.c.bf16 %v2455_v50, %v2453_v3  ;;  %v1549_v27 = vmul.f32 %v2455_v50, %v2455_v50 }
 0x141   : > { %v1577_v18 = vadd.f32 %v1576_v14, %v1546_v39  ;;  %v1509_v51 = vadd.f32 %v2456_v16, %v1508_v20  ;;  %v1547_v56 = vmul.f32 %v2456_v16, %v2456_v16  ;;  %v2138_v23 = vpack.c.bf16 %v2456_v16, %v2454_v57 }
 0x142   : > { %2198 = vst [vmem:[%s3097_s7 + $0x48] sm:$0xff] %v2143_v44   ;;  %v2363_v48 = vpop.f32.mrb[20].mxu1 }
 0x143   : > { %v1510_v24 = vadd.f32 %v2453_v3, %v1509_v51  ;;  %v1578_v54 = vadd.f32 %v1577_v18, %v1547_v56  ;;  %2197 = vst [vmem:[%s3097_s7 + $0x40] sm:$0xff] %v2138_v23   ;;  %v2411_v25 = vpop.f32.mrb[20].mxu0  ;;  %v1172_v7 = vpop.f32.mrb[21].mxu1 }
 0x144   : > { %v2457_v34 = vadd.f32 %v2411_v25, %v2363_v48  ;;  %v1414_v42 = vpop.f32.mrb[21].mxu0  ;;  %v2364_v26 = vpop.f32.mrb[22].mxu1 }
 0x145   : > { %v1579_v17 = vadd.f32 %v1578_v54, %v1548_v59  ;;  %v2458_v9 = vadd.f32 %v1414_v42, %v1172_v7  ;;  %v1511_v36 = vadd.f32 %v2455_v50, %v1510_v24  ;;  %v2412_v38 = vpop.f32.mrb[22].mxu0  ;;  %v1175_v28 = vpop.f32.mrb[23].mxu1 }
 0x146   : > { %v2459_v15 = vadd.f32 %v2412_v38, %v2364_v26  ;;  %v1417_v41 = vpop.f32.mrb[23].mxu0  ;;  %v1552_v35 = vmul.f32 %v2457_v34, %v2457_v34 }
 0x147   : > { %v1512_v55 = vadd.f32 %v2458_v9, %v1511_v36  ;;  %v1550_v45 = vmul.f32 %v2458_v9, %v2458_v9  ;;  %v1580_v30 = vadd.f32 %v1579_v17, %v1549_v27  ;;  %v2460_v46 = vadd.f32 %v1417_v41, %v1175_v28 }
 0x148   : > { %v2153_v49 = vpack.c.bf16 %v2459_v15, %v2457_v34  ;;  %v1553_v32 = vmul.f32 %v2459_v15, %v2459_v15 }
 0x149   : > { %v1581_v31 = vadd.f32 %v1580_v30, %v1550_v45  ;;  %v1513_v10 = vadd.f32 %v2460_v46, %v1512_v55  ;;  %v1551_v1 = vmul.f32 %v2460_v46, %v2460_v46  ;;  %v2148_v40 = vpack.c.bf16 %v2460_v46, %v2458_v9 }
 0x14a   : > { %2200 = vst [vmem:[%s3097_s7 + $0x58] sm:$0xff] %v2153_v49   ;;  %v2367_v0 = vpop.f32.mrb[24].mxu1 }
 0x14b   : > { %v1514_v11 = vadd.f32 %v2457_v34, %v1513_v10  ;;  %v1582_v19 = vadd.f32 %v1581_v31, %v1551_v1  ;;  %2199 = vst [vmem:[%s3097_s7 + $0x50] sm:$0xff] %v2148_v40   ;;  %v2415_v52 = vpop.f32.mrb[24].mxu0  ;;  %v1188_v21 = vpop.f32.mrb[25].mxu1 }
 0x14c   : > { %v2461_v53 = vadd.f32 %v2415_v52, %v2367_v0  ;;  %v1430_v58 = vpop.f32.mrb[25].mxu0  ;;  %v2368_v12 = vpop.f32.mrb[26].mxu1 }
 0x14d   : > { %v1583_v43 = vadd.f32 %v1582_v19, %v1552_v35  ;;  %v2462_v60 = vadd.f32 %v1430_v58, %v1188_v21  ;;  %v1515_v61 = vadd.f32 %v2459_v15, %v1514_v11  ;;  %v2416_v62 = vpop.f32.mrb[26].mxu0  ;;  %v1191_v47 = vpop.f32.mrb[27].mxu1 }
 0x14e   : > { %v2463_v63 = vadd.f32 %v2416_v62, %v2368_v12  ;;  %v1433_v22 = vpop.f32.mrb[27].mxu0  ;;  %v1556_v50 = vmul.f32 %v2461_v53, %v2461_v53 }
 0x14f   : > { %v1516_v33 = vadd.f32 %v2462_v60, %v1515_v61  ;;  %v1554_v3 = vmul.f32 %v2462_v60, %v2462_v60  ;;  %v1584_v6 = vadd.f32 %v1583_v43, %v1553_v32  ;;  %v2464_v37 = vadd.f32 %v1433_v22, %v1191_v47 }
 0x150   : > { %v2163_v8 = vpack.c.bf16 %v2463_v63, %v2461_v53  ;;  %v1557_v51 = vmul.f32 %v2463_v63, %v2463_v63 }
 0x151   : > { %v1585_v5 = vadd.f32 %v1584_v6, %v1554_v3  ;;  %v1517_v57 = vadd.f32 %v2464_v37, %v1516_v33  ;;  %v1555_v29 = vmul.f32 %v2464_v37, %v2464_v37  ;;  %v2158_v13 = vpack.c.bf16 %v2464_v37, %v2462_v60 }
 0x152   : > { %2202 = vst [vmem:[%s3097_s7 + $0x68] sm:$0xff] %v2163_v8   ;;  %v2371_v2 = vpop.f32.mrb[28].mxu1 }
 0x153   : > { %v1518_v4 = vadd.f32 %v2461_v53, %v1517_v57  ;;  %v1586_v20 = vadd.f32 %v1585_v5, %v1555_v29  ;;  %2201 = vst [vmem:[%s3097_s7 + $0x60] sm:$0xff] %v2158_v13   ;;  %v2419_v39 = vpop.f32.mrb[28].mxu0  ;;  %v1204_v14 = vpop.f32.mrb[29].mxu1 }
 0x154   : > { %v2465_v16 = vadd.f32 %v2419_v39, %v2371_v2  ;;  %v1446_v44 = vpop.f32.mrb[29].mxu0  ;;  %v2372_v18 = vpop.f32.mrb[30].mxu1 }
 0x155   : > { %v1587_v56 = vadd.f32 %v1586_v20, %v1556_v50  ;;  %v2466_v23 = vadd.f32 %v1446_v44, %v1204_v14  ;;  %v1519_v48 = vadd.f32 %v2463_v63, %v1518_v4  ;;  %v2420_v59 = vpop.f32.mrb[30].mxu0  ;;  %v1207_v24 = vpop.f32.mrb[31].mxu1 }
 0x156   : > { %v2467_v54 = vadd.f32 %v2420_v59, %v2372_v18  ;;  %v1449_v25 = vpop.f32.mrb[31].mxu0  ;;  %v1560_v28 = vmul.f32 %v2465_v16, %v2465_v16 }
 0x157   : > { %v1520_v7 = vadd.f32 %v2466_v23, %v1519_v48  ;;  %v1558_v34 = vmul.f32 %v2466_v23, %v2466_v23  ;;  %v1588_v42 = vadd.f32 %v1587_v56, %v1557_v51  ;;  %v2468_v26 = vadd.f32 %v1449_v25, %v1207_v24 }
 0x158   : > { %v2173_v27 = vpack.c.bf16 %v2467_v54, %v2465_v16  ;;  %v1561_v55 = vmul.f32 %v2467_v54, %v2467_v54 }
 0x159   : > { %v1589_v17 = vadd.f32 %v1588_v42, %v1558_v34  ;;  %v1521_v9 = vadd.f32 %v2468_v26, %v1520_v7  ;;  %v1559_v36 = vmul.f32 %v2468_v26, %v2468_v26  ;;  %v2168_v38 = vpack.c.bf16 %v2468_v26, %v2466_v23 }
 0x15a   : > { %2204 = vst [vmem:[%s3097_s7 + $0x78] sm:$0xff] %v2173_v27  }
 0x15b   : > { %v1522_v15 = vadd.f32 %v2465_v16, %v1521_v9  ;;  %v1590_v41 = vadd.f32 %v1589_v17, %v1559_v36  ;;  %2203 = vst [vmem:[%s3097_s7 + $0x70] sm:$0xff] %v2168_v38  }
 0x15d   : > { %v1523_v45 = vadd.f32 %v2467_v54, %v1522_v15  ;;  %v1591_v30 = vadd.f32 %v1590_v41, %v1560_v28 }
 0x15f   : > { %v1524_v46 = vrot.slane %v1523_v45, 4  ;;  %v1592_v49 = vadd.f32 %v1591_v30, %v1561_v55 }
 0x161   : > { %v1525_v31 = vadd.f32 %v1524_v46, %v1523_v45  ;;  %v1593_v10 = vrot.slane %v1592_v49, 4 }
 0x163   : > { %v1526_v1 = vrot.slane %v1525_v31, 2  ;;  %v1594_v40 = vadd.f32 %v1593_v10, %v1592_v49 }
 0x165   : > { %v1527_v0 = vadd.f32 %v1526_v1, %v1525_v31  ;;  %v1595_v35 = vrot.slane %v1594_v40, 2 }
 0x167   : > { %v1528_v11 = vrot.slane %v1527_v0, 1  ;;  %v1596_v19 = vadd.f32 %v1595_v35, %v1594_v40 }
 0x169   : > { %v1597_v52 = vrot.slane %v1596_v19, 1  ;;  %v1529_v21 = vadd.f32 %v1528_v11, %v1527_v0 }
 0x16b   : > { %v1598_v53 = vadd.f32 %v1597_v52, %v1596_v19 }
 0x16d   : > { %v1599_v58 = vsel %vm539_vm0, %v1529_v21, %v1598_v53 }
 0x16e   : > { %1600 = vst [vmem:[%s329_s9] sm:$0x3] %v1599_v58 }
 0x16f PF: > { %s17_s23 = sadd.s32 1, %s2571_s23   ;;  %s3141_s21 = smov %s2567_s22 }
 0x170   : > { %p14_p5 = scmp.ge.s32.totalorder %s17_s23, 4   ;;  %s3142_s22 = smov %s3144_s24 }
 0x172   :  { %16 = sbr.rel (!%p14_p5) target bundleno = 2 (0x2), region = 87 }

// kernel: basic_block_pallas.3
= control target key start
LH: loop header
LB: loop body
LE: loop exit
PB: predicated region body
PF: predicated region fallthrough
CT: control target
= control target key end

     0   :  { %s2321_s15 = smov 0   ;;  %s2323_s16 = smov 0   ;;  %s2799_s0 = inlined_call_operand.vmem [shape: f32[2,256,128], index: 0, kind: input, shape index: {}]   ;;  %s2800_s1 = inlined_call_operand.vmem [shape: f32[2,2,128], index: 1, kind: input, shape index: {}]   ;;  %s2801_s2 = inlined_call_operand.vmem [shape: bf16[3,128,128], index: 2, kind: input, shape index: {}]   ;;  %s2802_s3 = inlined_call_operand.vmem [shape: bf16[2,256,128], index: 3, kind: output, shape index: {0}]   ;;  %s2803_s4 = inlined_call_operand.vmem [shape: f32[2,2,128], index: 4, kind: output, shape index: {1}]  }
   0x1   :  { %s2325_s17 = smov 0  }
   0x2 LB: > { %s27_s18 = sadd.s32 1, %s2290_s16  ;;  %p1702_p0 = scmp.ge.s32.totalorder %s2294_s17, 1  ;;  %s2294_s17 = sphi %s2325_s17, %s15_s17   ;;  %s2290_s16 = sphi %s2323_s16, %s2805_s16   ;;  %s2286_s15 = sphi %s2321_s15, %s2804_s15  }
   0x3   : > { %p29_p1 = scmp.ge.s32.totalorder %s27_s18, 2  ;;  %p201_p2 = scmp.lt.s32.totalorder %s2294_s17, 3 }
   0x5   : > { %s2807_s18 = smov (%p29_p1, %s27_s18), 0  ;;  %p202_p3 = pnand %p1702_p0, %p201_p2 }
   0x6   : > { %v2248_v0 = vld [vmem:[%s2801_s2 + $0x40] sm:$0xff] (!%p202_p3)   ;;  %v2250_v2 = vld [vmem:[%s2801_s2 + $0x48] sm:$0xff] (!%p202_p3)   ;;  %p246_p4 = scmp.lt.s32.totalorder (!%p202_p3), %s2286_s15, 1  ;;  %v2252_v4 = vld [vmem:[%s2801_s2 + $0x50] sm:$0xff] (!%p202_p3)   ;;  %vm343_vm0 = vcmask (!%p202_p3), 1040384   ;;  %vm440_vm1 = vcmask (!%p202_p3), 1046528  }
   0x7   : > { %205 = sbr.rel (%p202_p3) target bundleno = 367 (0x16f), region = 32  ;;  %v2345_v1 = vld [vmem:[%s2801_s2] sm:$0xff] (!%p202_p3)   ;;  %2000 = vmatprep.subr.bf16.mxu1 (!%p202_p3), %v2248_v0  ;;  %v2354_v3 = vld [vmem:[%s2801_s2 + $0x8] sm:$0xff] (!%p202_p3)   ;;  %v2364_v5 = vld [vmem:[%s2801_s2 + $0x10] sm:$0xff] (!%p202_p3)  }
   0x8   : > { %2048 = vmatprep.subr.bf16.mxu0 (!%p202_p3), %v2345_v1  ;;  %2001 = vmatpush3.bf16.msra.mxu1 (!%p202_p3), %v2248_v0  ;;  %v2254_v6 = vld [vmem:[%s2801_s2 + $0x58] sm:$0xff] (!%p202_p3)   ;;  %v2256_v8 = vld [vmem:[%s2801_s2 + $0x60] sm:$0xff] (!%p202_p3)   ;;  %v2258_v10 = vld [vmem:[%s2801_s2 + $0x68] sm:$0xff] (!%p202_p3)  }
   0x9   : > { %2049 = vmatpush3.bf16.msra.mxu0 (!%p202_p3), %v2345_v1  ;;  %2002 = vmatprep.subr.bf16.mxu1 (!%p202_p3), %v2250_v2  ;;  %v2376_v7 = vld [vmem:[%s2801_s2 + $0x18] sm:$0xff] (!%p202_p3)   ;;  %v2388_v9 = vld [vmem:[%s2801_s2 + $0x20] sm:$0xff] (!%p202_p3)   ;;  %v2416_v14 = vld [vmem:[%s2801_s2 + $0x28] sm:$0xff] (!%p202_p3)  }
   0xa   : > { %2050 = vmatprep.subr.bf16.mxu0 (!%p202_p3), %v2354_v3  ;;  %v2260_v20 = vld [vmem:[%s2801_s2 + $0x70] sm:$0xff] (!%p202_p3)   ;;  %v2262_v27 = vld [vmem:[%s2801_s2 + $0x78] sm:$0xff] (!%p202_p3)   ;;  %v2264_v35 = vld [vmem:[%s2801_s2 + $0x80] sm:$0xff] (!%p202_p3)  }
   0xb   : > { %v2433_v22 = vld [vmem:[%s2801_s2 + $0x30] sm:$0xff] (!%p202_p3)   ;;  %v2457_v30 = vld [vmem:[%s2801_s2 + $0x38] sm:$0xff] (!%p202_p3)   ;;  %v2265_v47 = vld [vmem:[%s2801_s2 + $0x88] sm:$0xff] (!%p202_p3)  }
   0xc   : > { %2003 = vmatpush3.bf16.msra.mxu1 (!%p202_p3), %v2250_v2  ;;  %v2266_v53 = vld [vmem:[%s2801_s2 + $0x90] sm:$0xff] (!%p202_p3)   ;;  %v2267_v2 = vld [vmem:[%s2801_s2 + $0x98] sm:$0xff] (!%p202_p3)  }
   0xd   : > { %2051 = vmatpush3.bf16.msra.mxu0 (!%p202_p3), %v2354_v3  ;;  %2004 = vmatprep.subr.bf16.mxu1 (!%p202_p3), %v2252_v4 }
   0xe   : > { %s2809_s15 = smov (!%p246_p4, %s2286_s15), 1  ;;  %2052 = vmatprep.subr.bf16.mxu0 %v2364_v5 }
   0xf   : > { %s1799_s9 = sshll.u32 %s2809_s15, 8  ;;  %s1705_s10 = sshll.u32 %s2809_s15, 1 }
  0x10   : > { %2005 = vmatpush3.bf16.msra.mxu1 %v2252_v4  ;;  %s2393_s21 = scalar_lea.vmem %s2799_s0, %s1799_s9  ;;  %s259_s24 = scalar_lea.vmem %s2800_s1, %s1705_s10 }
  0x11   : > { %2053 = vmatpush3.bf16.msra.mxu0 %v2364_v5  ;;  %2006 = vmatprep.subr.bf16.mxu1 %v2254_v6  ;;  %v2405_v11 = vld [vmem:[%s2393_s21] sm:$0xff]  ;;  %v2408_v12 = vld [vmem:[%s2393_s21 + $0x8] sm:$0xff]  ;;  %v2436_v23 = vld [vmem:[%s2393_s21 + $0x10] sm:$0xff]  ;;  %s275_s13 = scalar_lea.vmem %s2803_s4, %s1705_s10 }
  0x12   : > { %2054 = vmatprep.subr.bf16.mxu0 %v2376_v7  ;;  %v2410_v13 = vld [vmem:[%s259_s24] sm:$0x3]  ;;  %v344_v15 = vrot.slane %v2405_v11, 7  ;;  %v345_v16 = vrot.slane %v2408_v12, 7  ;;  %v572_v17 = vpack.c.bf16 %v2408_v12, %v2405_v11  ;;  %v2439_v24 = vld [vmem:[%s2393_s21 + $0x18] sm:$0xff]  ;;  %v2445_v26 = vld [vmem:[%s2393_s21 + $0x28] sm:$0xff] }
  0x13   : > { %v2442_v25 = vld [vmem:[%s2393_s21 + $0x20] sm:$0xff]  ;;  %v347_v28 = vrot.slane %v2436_v23, 7  ;;  %v349_v29 = vrot.slane %v2439_v24, 7  ;;  %v353_v32 = vrot.slane %v2445_v26, 7  ;;  %v2469_v36 = vld [vmem:[%s2393_s21 + $0x30] sm:$0xff]  ;;  %v2472_v37 = vld [vmem:[%s2393_s21 + $0x38] sm:$0xff]  ;;  %v573_v38 = vpack.c.bf16 %v2439_v24, %v2436_v23 }
  0x14   : > { %2007 = vmatpush3.bf16.msra.mxu1 %v2254_v6  ;;  %v346_v18 = vsel %vm343_vm0, %v344_v15, %v345_v16  ;;  %v439_v19 = vsel %vm343_vm0, %v2410_v13, %v344_v15  ;;  %2016 = vmatprep.mubr.bf16.mxu1 %v572_v17  ;;  %v351_v31 = vrot.slane %v2442_v25, 7  ;;  %v2479_v41 = vld [vmem:[%s2393_s21 + $0x40] sm:$0xff]  ;;  %v2482_v42 = vld [vmem:[%s2393_s21 + $0x48] sm:$0xff]  ;;  %v574_v44 = vpack.c.bf16 %v2445_v26, %v2442_v25  ;;  %v2504_v56 = vld [vmem:[%s2393_s21 + $0x50] sm:$0xff] }
  0x15   : > { %2055 = vmatpush3.bf16.msra.mxu0 %v2376_v7  ;;  %2008 = vmatprep.subr.bf16.mxu1 %v2256_v8  ;;  %v540_v21 = vpack.c.bf16 %v346_v18, %v439_v19  ;;  %v348_v33 = vsel %vm343_vm0, %v345_v16, %v347_v28  ;;  %v350_v34 = vsel %vm343_vm0, %v347_v28, %v349_v29  ;;  %v355_v45 = vrot.slane %v2469_v36, 7  ;;  %v2507_v57 = vld [vmem:[%s2393_s21 + $0x58] sm:$0xff]  ;;  %v2513_v59 = vld [vmem:[%s2393_s21 + $0x60] sm:$0xff]  ;;  %v2516_v60 = vld [vmem:[%s2393_s21 + $0x68] sm:$0xff] }
  0x16   : > { %2056 = vmatprep.subr.bf16.mxu0 %v2388_v9  ;;  %v352_v39 = vsel %vm343_vm0, %v349_v29, %v351_v31  ;;  %v354_v40 = vsel %vm343_vm0, %v351_v31, %v353_v32  ;;  %v541_v43 = vpack.c.bf16 %v350_v34, %v348_v33  ;;  %v357_v46 = vrot.slane %v2472_v37, 7  ;;  %v2538_v17 = vld [vmem:[%s2393_s21 + $0x70] sm:$0xff]  ;;  %v2541_v18 = vld [vmem:[%s2393_s21 + $0x78] sm:$0xff]  ;;  %v2269_v33 = vld [vmem:[%s2801_s2 + $0xa8] sm:$0xff]  }
  0x17   : > { %2064 = vmatprep.mubr.bf16.mxu0 %v540_v21  ;;  %v542_v48 = vpack.c.bf16 %v354_v40, %v352_v39  ;;  %v359_v49 = vrot.slane %v2479_v41, 7  ;;  %v361_v50 = vrot.slane %v2482_v42, 7  ;;  %v356_v51 = vsel %vm343_vm0, %v353_v32, %v355_v45  ;;  %v2566_v34 = vld [vmem:[%s2393_s21 + $0x88] sm:$0xff] }
  0x18   : > { %2009 = vmatpush3.bf16.msra.mxu1 %v2256_v8  ;;  %v358_v52 = vsel %vm343_vm0, %v355_v45, %v357_v46  ;;  %v575_v58 = vpack.c.bf16 %v2472_v37, %v2469_v36  ;;  %v576_v62 = vpack.c.bf16 %v2482_v42, %v2479_v41  ;;  %v363_v0 = vrot.slane %v2504_v56, 7 }
  0x19   : > { %2057 = vmatpush3.bf16.msra.mxu0 %v2388_v9  ;;  %2010 = vmatprep.subr.bf16.mxu1 %v2258_v10  ;;  %v360_v54 = vsel %vm343_vm0, %v357_v46, %v359_v49  ;;  %v362_v55 = vsel %vm343_vm0, %v359_v49, %v361_v50  ;;  %v543_v61 = vpack.c.bf16 %v358_v52, %v356_v51  ;;  %v369_v4 = vrot.slane %v2516_v60, 7  ;;  %v2588_v49 = vld [vmem:[%s2393_s21 + $0xf0] sm:$0xff] }
  0x1a   : > { %2058 = vmatprep.subr.bf16.mxu0 %v2416_v14  ;;  %v544_v63 = vpack.c.bf16 %v362_v55, %v360_v54  ;;  %v364_v6 = vsel %vm343_vm0, %v361_v50, %v363_v0  ;;  %v577_v19 = vpack.c.bf16 %v2507_v57, %v2504_v56  ;;  %v578_v21 = vpack.c.bf16 %v2516_v60, %v2513_v59  ;;  %v2598_v50 = vld [vmem:[%s2393_s21 + $0x90] sm:$0xff]  ;;  %v2609_v54 = vld [vmem:[%s2393_s21 + $0xa8] sm:$0xff] }
  0x1b   : > { %v373_v28 = vrot.slane %v2541_v18, 7  ;;  %v441_v29 = vrot.slane %v2405_v11, 1  ;;  %v442_v31 = vrot.slane %v2408_v12, 1  ;;  %v444_v32 = vrot.slane %v2436_v23, 1  ;;  %v2563_v23 = vld [vmem:[%s2393_s21 + $0x80] sm:$0xff] }
  0x1c   : > { %2011 = vmatpush3.bf16.msra.mxu1 %v2258_v10  ;;  %v2268_v10 = vld [vmem:[%s2801_s2 + $0xa0] sm:$0xff]   ;;  %v579_v39 = vpack.c.bf16 %v2541_v18, %v2538_v17  ;;  %v448_v45 = vrot.slane %v2442_v25, 1  ;;  %v500_v25 = vrot.slane %v2588_v49, 1 }
  0x1d   : > { %2059 = vmatpush3.bf16.msra.mxu0 %v2416_v14  ;;  %2012 = vmatprep.subr.bf16.mxu1 %v2260_v20 }
  0x1e   : > { %2060 = vmatprep.subr.bf16.mxu0 %v2433_v22 }
  0x20   : > { %2013 = vmatpush3.bf16.msra.mxu1 %v2260_v20 }
  0x21   : > { %2061 = vmatpush3.bf16.msra.mxu0 %v2433_v22  ;;  %2014 = vmatprep.subr.bf16.mxu1 %v2262_v27 }
  0x22   : > { %2062 = vmatprep.subr.bf16.mxu0 %v2457_v30 }
  0x24   : > { %2015 = vmatpush3.bf16.msra.mxu1 %v2262_v27 }
  0x25   : > { %2063 = vmatpush3.bf16.msra.mxu0 %v2457_v30  ;;  %2144 = vmatprep.subr.bf16.mxu1 %v2345_v1 }
  0x26   : > { %2096 = vmatprep.subr.bf16.mxu0 %v2264_v35 }
  0x27   : > { %2017 = vmatmul.mubr.bf16.vlgmr.msra.gmra.mrb[0].mxu1 %v573_v38  ;;  %v445_v38 = vsel %vm440_vm1, %v442_v31, %v444_v32 }
  0x28   : > { %2065 = vmatmul.mubr.bf16.vlgmr.msra.gmra.mrb[0].mxu0 %v541_v43  ;;  %2152 = vmatpush3.bf16.msra.mxu1 %v2345_v1  ;;  %v365_v1 = vrot.slane %v2507_v57, 7  ;;  %v580_v43 = vpack.c.bf16 %v2566_v34, %v2563_v23 }
  0x29   : > { %2097 = vmatpush3.bf16.msra.mxu0 %v2264_v35  ;;  %2020 = vmatprep.mubr.bf16.mxu1 %v574_v44  ;;  %v443_v35 = vsel %vm440_vm1, %v441_v29, %v442_v31  ;;  %v446_v44 = vrot.slane %v2439_v24, 1  ;;  %v2591_v24 = vld [vmem:[%s2393_s21 + $0xf8] sm:$0xff]  ;;  %v466_v29 = vrot.slane %v2516_v60, 1  ;;  %v468_v31 = vrot.slane %v2538_v17, 1 }
  0x2a   : > { %2098 = vmatprep.subr.bf16.mxu0 %v2265_v47  ;;  %2068 = vmatprep.mubr.bf16.mxu0 %v542_v48  ;;  %v366_v8 = vsel %vm343_vm0, %v363_v0, %v365_v1  ;;  %v1023_v46 = vpack.c.bf16 %v445_v38, %v443_v35  ;;  %v2271_v48 = vld [vmem:[%s2801_s2 + $0xb8] sm:$0xff]   ;;  %v470_v35 = vrot.slane %v2541_v18, 1 }
  0x2b   : > { %2145 = vmatprep.subr.bf16.mxu1 %v2354_v3  ;;  %v545_v20 = vpack.c.bf16 %v366_v8, %v364_v6  ;;  %v447_v51 = vsel %vm440_vm1, %v444_v32, %v446_v44  ;;  %v449_v52 = vsel %vm440_vm1, %v446_v44, %v448_v45  ;;  %v460_v6 = vrot.slane %v2504_v56, 1  ;;  %v2635_v8 = vld [vmem:[%s2393_s21 + $0xb0] sm:$0xff] }
  0x2c   : > { %2153 = vmatpush3.bf16.msra.mxu1 %v2354_v3  ;;  %v367_v3 = vrot.slane %v2513_v59, 7  ;;  %v2659_v32 = vld [vmem:[%s2393_s21 + $0xd0] sm:$0xff]  ;;  %v472_v44 = vrot.slane %v2563_v23, 1 }
  0x2d   : > { %2099 = vmatpush3.bf16.msra.mxu0 %v2265_v47  ;;  %2146 = vmatprep.subr.bf16.mxu1 %v2364_v5  ;;  %v450_v47 = vrot.slane %v2445_v26, 1  ;;  %v502_v26 = vrot.slane %v2591_v24, 1 }
  0x2e   : > { %2100 = vmatprep.subr.bf16.mxu0 %v2266_v53  ;;  %v368_v15 = vsel %vm343_vm0, %v365_v1, %v367_v3  ;;  %v370_v16 = vsel %vm343_vm0, %v367_v3, %v369_v4  ;;  %v456_v1 = vrot.slane %v2479_v41, 1 }
  0x2f   : > { %2021 = vmatmul.mubr.bf16.gmra.mrb[4].mxu1 %v575_v58  ;;  %v546_v27 = vpack.c.bf16 %v370_v16, %v368_v15  ;;  %v451_v55 = vsel %vm440_vm1, %v448_v45, %v450_v47  ;;  %v2643_v15 = vld [vmem:[%s2393_s21 + $0xc0] sm:$0xff] }
  0x30   : > { %2069 = vmatmul.mubr.bf16.gmra.mrb[4].mxu0 %v543_v61  ;;  %2024 = vmatprep.mubr.bf16.mxu1 %v576_v62  ;;  %v2620_v61 = vsel %vm440_vm1, %v500_v25, %v502_v26  ;;  %v1024_v62 = vpack.c.bf16 %v449_v52, %v447_v51  ;;  %v379_v51 = vrot.slane %v2598_v50, 7  ;;  %v587_v52 = vpack.c.bf16 %v2591_v24, %v2588_v49 }
  0x31   : > { %2101 = vmatpush3.bf16.msra.mxu0 %v2266_v53  ;;  %2072 = vmatprep.mubr.bf16.mxu0 %v544_v63  ;;  %v2606_v53 = vld [vmem:[%s2393_s21 + $0xa0] sm:$0xff] }
  0x32   : > { %2102 = vmatprep.subr.bf16.mxu0 %v2267_v2  ;;  %2154 = vmatpush3.bf16.msra.mxu1 %v2364_v5  ;;  %v371_v5 = vrot.slane %v2538_v17, 7  ;;  %v582_v63 = vpack.c.bf16 %v2609_v54, %v2606_v53  ;;  %v469_v17 = vsel %vm440_vm1, %v466_v29, %v468_v31  ;;  %v383_v18 = vrot.slane %v2606_v53, 7 }
  0x33   : > { %2147 = vmatprep.subr.bf16.mxu1 %v2376_v7 }
  0x34   : > { %v372_v11 = vsel %vm343_vm0, %v369_v4, %v371_v5  ;;  %v374_v12 = vsel %vm343_vm0, %v371_v5, %v373_v28  ;;  %v458_v4 = vrot.slane %v2482_v42, 1  ;;  %v2646_v42 = vld [vmem:[%s2393_s21 + $0xc8] sm:$0xff] }
  0x35   : > { %2103 = vmatpush3.bf16.msra.mxu0 %v2267_v2  ;;  %v547_v40 = vpack.c.bf16 %v374_v12, %v372_v11 }
  0x36   : > { %2104 = vmatprep.subr.bf16.mxu0 %v2268_v10  ;;  %2155 = vmatpush3.bf16.msra.mxu1 %v2376_v7  ;;  %v2270_v7 = vld [vmem:[%s2801_s2 + $0xb0] sm:$0xff]   ;;  %v461_v56 = vsel %vm440_vm1, %v458_v4, %v460_v6 }
  0x37   : > { %2025 = vmatmul.mubr.bf16.gmra.mrb[8].mxu1 %v577_v19  ;;  %2148 = vmatprep.subr.bf16.mxu1 %v2388_v9 }
  0x38   : > { %2073 = vmatmul.mubr.bf16.gmra.mrb[8].mxu0 %v545_v20  ;;  %2028 = vmatprep.mubr.bf16.mxu1 %v578_v21  ;;  %v584_v20 = vpack.c.bf16 %v2646_v42, %v2643_v15  ;;  %v462_v21 = vrot.slane %v2507_v57, 1  ;;  %v2667_v57 = vld [vmem:[%s2393_s21 + $0xe0] sm:$0xff] }
  0x39   : > { %2105 = vmatpush3.bf16.msra.mxu0 %v2268_v10  ;;  %2076 = vmatprep.mubr.bf16.mxu0 %v546_v27  ;;  %v464_v27 = vrot.slane %v2513_v59, 1  ;;  %v2670_v59 = vld [vmem:[%s2393_s21 + $0xe8] sm:$0xff] }
  0x3a   : > { %2106 = vmatprep.subr.bf16.mxu0 %v2269_v33  ;;  %2156 = vmatpush3.bf16.msra.mxu1 %v2388_v9  ;;  %v452_v9 = vrot.slane %v2469_v36, 1  ;;  %v537_v36 = vrot.slane %v2410_v13, 2  ;;  %v463_v11 = vsel %vm440_vm1, %v460_v6, %v462_v21 }
  0x3b   : > { %2149 = vmatprep.subr.bf16.mxu1 %v2416_v14  ;;  %v465_v12 = vsel %vm440_vm1, %v462_v21, %v464_v27  ;;  %v467_v60 = vsel %vm440_vm1, %v464_v27, %v466_v29  ;;  %v391_v27 = vrot.slane %v2643_v15, 7  ;;  %v488_v29 = vrot.slane %v2643_v15, 1 }
  0x3c   : > { %v453_v13 = vsel %vm440_vm1, %v450_v47, %v452_v9  ;;  %v2625_v0 = vsel %vm440_vm1, %v502_v26, %v537_v36  ;;  %v1028_v38 = vpack.c.bf16 %v465_v12, %v463_v11  ;;  %v1029_v45 = vpack.c.bf16 %v469_v17, %v467_v60 }
  0x3d   : > { %2107 = vmatpush3.bf16.msra.mxu0 %v2269_v33  ;;  %v1025_v2 = vpack.c.bf16 %v453_v13, %v451_v55  ;;  %v1038_v3 = vpack.c.bf16 %v2625_v0, %v2620_v61  ;;  %v2662_v33 = vld [vmem:[%s2393_s21 + $0xd8] sm:$0xff]  ;;  %v476_v47 = vrot.slane %v2598_v50, 1  ;;  %v490_v11 = vrot.slane %v2646_v42, 1 }
  0x3e   : > { %2108 = vmatprep.subr.bf16.mxu0 %v2270_v7  ;;  %2157 = vmatpush3.bf16.msra.mxu1 %v2416_v14  ;;  %v2601_v14 = vld [vmem:[%s2393_s21 + $0x98] sm:$0xff]  ;;  %v492_v12 = vrot.slane %v2659_v32, 1 }
  0x3f   : > { %2029 = vmatmul.mubr.bf16.gmra.mrb[12].mxu1 %v579_v39  ;;  %2150 = vmatprep.subr.bf16.mxu1 %v2433_v22  ;;  %v581_v58 = vpack.c.bf16 %v2601_v14, %v2598_v50  ;;  %v586_v39 = vpack.c.bf16 %v2670_v59, %v2667_v57  ;;  %v381_v55 = vrot.slane %v2601_v14, 7  ;;  %v478_v13 = vrot.slane %v2601_v14, 1 }
  0x40   : > { %2077 = vmatmul.mubr.bf16.gmra.mrb[12].mxu0 %v547_v40  ;;  %2032 = vmatprep.mubr.bf16.mxu1 %v580_v43  ;;  %v375_v40 = vrot.slane %v2563_v23, 7  ;;  %v377_v43 = vrot.slane %v2566_v34, 7  ;;  %v484_v50 = vrot.slane %v2635_v8, 1 }
  0x41   : > { %2109 = vmatpush3.bf16.msra.mxu0 %v2270_v7  ;;  %2112 = vmatprep.mubr.bf16.mxu0 %v1023_v46  ;;  %v585_v7 = vpack.c.bf16 %v2662_v33, %v2659_v32  ;;  %v474_v46 = vrot.slane %v2566_v34, 1  ;;  %v382_v14 = vsel %vm343_vm0, %v379_v51, %v381_v55 }
  0x42   : > { %2110 = vmatprep.subr.bf16.mxu0 %v2271_v48  ;;  %2158 = vmatpush3.bf16.msra.mxu1 %v2433_v22  ;;  %v454_v22 = vrot.slane %v2472_v37, 1  ;;  %v2638_v37 = vld [vmem:[%s2393_s21 + $0xb8] sm:$0xff]  ;;  %v376_v26 = vsel %vm343_vm0, %v373_v28, %v375_v40  ;;  %v378_v36 = vsel %vm343_vm0, %v375_v40, %v377_v43  ;;  %v385_v28 = vrot.slane %v2609_v54, 7  ;;  %s1800_s21 = sshll.u32 %s2809_s15, 7 }
  0x43   : > { %2151 = vmatprep.subr.bf16.mxu1 %v2457_v30  ;;  %v583_v16 = vpack.c.bf16 %v2638_v37, %v2635_v8  ;;  %v475_v23 = vsel %vm440_vm1, %v472_v44, %v474_v46  ;;  %v477_v34 = vsel %vm440_vm1, %v474_v46, %v476_v47  ;;  %v397_v40 = vrot.slane %v2662_v33, 7  ;;  %s2762_s9 = scalar_lea.vmem %s2802_s3, %s1800_s21 }
  0x44   : > { %v455_v41 = vsel %vm440_vm1, %v452_v9, %v454_v22  ;;  %v457_v10 = vsel %vm440_vm1, %v454_v22, %v456_v1  ;;  %v471_v9 = vsel %vm440_vm1, %v468_v31, %v470_v35  ;;  %v1031_v22 = vpack.c.bf16 %v477_v34, %v475_v23 }
  0x45   : > { %2111 = vmatpush3.bf16.msra.mxu0 %v2271_v48  ;;  %v1026_v19 = vpack.c.bf16 %v457_v10, %v455_v41  ;;  %v473_v48 = vsel %vm440_vm1, %v470_v35, %v472_v44  ;;  %v384_v41 = vsel %vm343_vm0, %v381_v55, %v383_v18  ;;  %v493_v35 = vsel %vm440_vm1, %v490_v11, %v492_v12 }
  0x46   : > { %2159 = vmatpush3.bf16.msra.mxu1 %v2457_v30  ;;  %v459_v30 = vsel %vm440_vm1, %v456_v1, %v458_v4  ;;  %v482_v1 = vrot.slane %v2609_v54, 1  ;;  %v479_v4 = vsel %vm440_vm1, %v476_v47, %v478_v13  ;;  %v399_v46 = vrot.slane %v2667_v57, 7 }
  0x47   : > { %2033 = vmatmul.mubr.bf16.gmra.mrb[16].mxu1 %v581_v58  ;;  %v1027_v5 = vpack.c.bf16 %v461_v56, %v459_v30  ;;  %v1030_v58 = vpack.c.bf16 %v473_v48, %v471_v9  ;;  %v387_v30 = vrot.slane %v2635_v8, 7  ;;  %v401_v47 = vrot.slane %v2670_v59, 7 }
  0x48   : > { %2113 = vmatmul.mubr.bf16.vlgmr.msra.gmra.mrb[0].mxu0 %v1024_v62  ;;  %2036 = vmatprep.mubr.bf16.mxu1 %v582_v63  ;;  %v548_v62 = vpack.c.bf16 %v378_v36, %v376_v26  ;;  %v480_v63 = vrot.slane %v2606_v53, 1  ;;  %v386_v53 = vsel %vm343_vm0, %v383_v18, %v385_v28  ;;  %v485_v10 = vsel %vm440_vm1, %v482_v1, %v484_v50 }
  0x49   : > { %2116 = vmatprep.mubr.bf16.mxu0 %v1025_v2  ;;  %v380_v2 = vsel %vm343_vm0, %v377_v43, %v379_v51  ;;  %v550_v21 = vpack.c.bf16 %v386_v53, %v384_v41  ;;  %v388_v8 = vsel %vm343_vm0, %v385_v28, %v387_v30  ;;  %v494_v43 = vrot.slane %v2662_v33, 1 }
  0x4a   : > { %v481_v6 = vsel %vm440_vm1, %v478_v13, %v480_v63  ;;  %v483_v54 = vsel %vm440_vm1, %v480_v63, %v482_v1  ;;  %v549_v56 = vpack.c.bf16 %v382_v14, %v380_v2  ;;  %v496_v9 = vrot.slane %v2667_v57, 1 }
  0x4b   : > { %v1033_v31 = vpack.c.bf16 %v485_v10, %v483_v54  ;;  %v498_v26 = vrot.slane %v2670_v59, 1  ;;  %v495_v33 = vsel %vm440_vm1, %v492_v12, %v494_v43  ;;  %v400_v34 = vsel %vm343_vm0, %v397_v40, %v399_v46 }
  0x4c   : > { %v497_v23 = vsel %vm440_vm1, %v494_v43, %v496_v9  ;;  %v402_v51 = vsel %vm343_vm0, %v399_v46, %v401_v47  ;;  %v403_v55 = vrot.slane %v2588_v49, 7  ;;  %v405_v13 = vrot.slane %v2591_v24, 7 }
  0x4d   : > { %v499_v57 = vsel %vm440_vm1, %v496_v9, %v498_v26  ;;  %v501_v59 = vsel %vm440_vm1, %v498_v26, %v500_v25 }
  0x4e   : > { %v1037_v18 = vpack.c.bf16 %v501_v59, %v499_v57  ;;  %v404_v28 = vsel %vm343_vm0, %v401_v47, %v403_v55  ;;  %v406_v63 = vsel %vm343_vm0, %v403_v55, %v405_v13 }
  0x4f   : > { %2037 = vmatmul.mubr.bf16.gmra.mrb[20].mxu1 %v583_v16  ;;  %v389_v16 = vrot.slane %v2638_v37, 7 }
  0x50   : > { %2117 = vmatmul.mubr.bf16.gmra.mrb[4].mxu0 %v1026_v19  ;;  %2040 = vmatprep.mubr.bf16.mxu1 %v584_v20  ;;  %v486_v19 = vrot.slane %v2638_v37, 1  ;;  %v1032_v20 = vpack.c.bf16 %v481_v6, %v479_v4 }
  0x51   : > { %2120 = vmatprep.mubr.bf16.mxu0 %v1027_v5  ;;  %v393_v5 = vrot.slane %v2646_v42, 7  ;;  %v390_v37 = vsel %vm343_vm0, %v387_v30, %v389_v16  ;;  %v491_v42 = vsel %vm440_vm1, %v488_v29, %v490_v11 }
  0x52   : > { %v487_v60 = vsel %vm440_vm1, %v484_v50, %v486_v19  ;;  %v489_v17 = vsel %vm440_vm1, %v486_v19, %v488_v29  ;;  %v1035_v48 = vpack.c.bf16 %v493_v35, %v491_v42 }
  0x53   : > { %v394_v15 = vsel %vm343_vm0, %v391_v27, %v393_v5  ;;  %v1034_v44 = vpack.c.bf16 %v489_v17, %v487_v60 }
  0x57   : > { %2041 = vmatmul.mubr.bf16.gmra.mrb[24].mxu1 %v585_v7  ;;  %v392_v7 = vsel %vm343_vm0, %v389_v16, %v391_v27 }
  0x58   : > { %2121 = vmatmul.mubr.bf16.gmra.mrb[8].mxu0 %v1028_v38  ;;  %2044 = vmatprep.mubr.bf16.mxu1 %v586_v39  ;;  %v395_v38 = vrot.slane %v2659_v32, 7  ;;  %v551_v39 = vpack.c.bf16 %v390_v37, %v388_v8 }
  0x59   : > { %2124 = vmatprep.mubr.bf16.mxu0 %v1029_v45  ;;  %v552_v45 = vpack.c.bf16 %v394_v15, %v392_v7 }
  0x5a   : > { %v396_v32 = vsel %vm343_vm0, %v393_v5, %v395_v38  ;;  %v398_v36 = vsel %vm343_vm0, %v395_v38, %v397_v40 }
  0x5f   : > { %2045 = vmatmul.mubr.bf16.gmra.mrb[28].mxu1 %v587_v52  ;;  %v553_v52 = vpack.c.bf16 %v398_v36, %v396_v32 }
  0x60   : > { %2125 = vmatmul.mubr.bf16.gmra.mrb[12].mxu0 %v1030_v58  ;;  %2080 = vmatprep.mubr.bf16.mxu1 %v548_v62  ;;  %v1036_v58 = vpack.c.bf16 %v497_v23, %v495_v33  ;;  %v554_v62 = vpack.c.bf16 %v402_v51, %v400_v34 }
  0x61   : > { %2128 = vmatprep.mubr.bf16.mxu0 %v1031_v22  ;;  %v555_v22 = vpack.c.bf16 %v406_v63, %v404_v28 }
  0x67   : > { %2081 = vmatmul.mubr.bf16.vlgmr.msra.gmra.mrb[16].mxu1 %v549_v56 }
  0x68   : > { %2129 = vmatmul.mubr.bf16.gmra.mrb[16].mxu0 %v1032_v20  ;;  %2084 = vmatprep.mubr.bf16.mxu1 %v550_v21 }
  0x69   : > { %2132 = vmatprep.mubr.bf16.mxu0 %v1033_v31 }
  0x6f   : > { %2085 = vmatmul.mubr.bf16.gmra.mrb[20].mxu1 %v551_v39 }
  0x70   : > { %2133 = vmatmul.mubr.bf16.gmra.mrb[20].mxu0 %v1034_v44  ;;  %2088 = vmatprep.mubr.bf16.mxu1 %v552_v45 }
  0x71   : > { %2136 = vmatprep.mubr.bf16.mxu0 %v1035_v48 }
  0x77   : > { %2089 = vmatmul.mubr.bf16.gmra.mrb[24].mxu1 %v553_v52 }
  0x78   : > { %2137 = vmatmul.mubr.bf16.gmra.mrb[24].mxu0 %v1036_v58  ;;  %2092 = vmatprep.mubr.bf16.mxu1 %v554_v62 }
  0x79   : > { %2140 = vmatprep.mubr.bf16.mxu0 %v1037_v18 }
  0x7f   : > { %2093 = vmatmul.mubr.bf16.gmra.mrb[28].mxu1 %v555_v22 }
  0x80   : > { %2141 = vmatmul.mubr.bf16.gmra.mrb[28].mxu0 %v1038_v3 }
  0xfa   : > { %v2018_v49 = vpop.f32.mrb[0].mxu1 }
  0xfb   : > { %v687_v25 = vpop.f32.mrb[1].mxu1 }
  0xfc   : > { %v2019_v24 = vpop.f32.mrb[2].mxu1 }
  0xfd   : > { %v690_v1 = vpop.f32.mrb[3].mxu1 }
 0x102   : > { %v2022_v50 = vpop.f32.mrb[4].mxu1 }
 0x103   : > { %v703_v2 = vpop.f32.mrb[5].mxu1 }
 0x104   : > { %v2023_v14 = vpop.f32.mrb[6].mxu1 }
 0x105   : > { %v706_v4 = vpop.f32.mrb[7].mxu1 }
 0x10a   : > { %v2026_v6 = vpop.f32.mrb[8].mxu1 }
 0x10b   : > { %v719_v41 = vpop.f32.mrb[9].mxu1 }
 0x10c   : > { %v2027_v53 = vpop.f32.mrb[10].mxu1 }
 0x10d   : > { %v722_v54 = vpop.f32.mrb[11].mxu1 }
 0x112   : > { %v2750_v10 = vpop.f32.mrb[12].mxu1 }
 0x113   : > { %v2752_v30 = vpop.f32.mrb[13].mxu1 }
 0x114   : > { %v2754_v56 = vpop.f32.mrb[14].mxu1 }
 0x115   : > { %v2756_v61 = vpop.f32.mrb[15].mxu1 }
 0x11b   : > { %v2114_v0 = vpop.f32.mrb[0].mxu0 }
 0x11c   : > { %v2160_v3 = vadd.f32 %v2114_v0, %v2018_v49  ;;  %v1138_v16 = vpop.f32.mrb[1].mxu0 }
 0x11d   : > { %v2161_v19 = vadd.f32 %v1138_v16, %v687_v25  ;;  %v2115_v20 = vpop.f32.mrb[2].mxu0 }
 0x11e   : > { %v2162_v21 = vadd.f32 %v2115_v20, %v2019_v24  ;;  %v1141_v27 = vpop.f32.mrb[3].mxu0  ;;  %v1336_v37 = vmul.f32 %v2160_v3, %v2160_v3 }
 0x11f   : > { %v2163_v5 = vadd.f32 %v1141_v27, %v690_v1  ;;  %v1334_v31 = vmul.f32 %v2161_v19, %v2161_v19 }
 0x120   : > { %v1841_v29 = vpack.c.bf16 %v2162_v21, %v2160_v3  ;;  %v1337_v35 = vmul.f32 %v2162_v21, %v2162_v21 }
 0x121   : > { %v1297_v11 = vadd.f32 %v2163_v5, %v2161_v19  ;;  %v1335_v12 = vmul.f32 %v2163_v5, %v2163_v5  ;;  %v1836_v8 = vpack.c.bf16 %v2163_v5, %v2161_v19 }
 0x122   : > { %1913 = vst [vmem:[%s2762_s9 + $0x8] sm:$0xff] %v1841_v29  }
 0x123   : > { %v1298_v60 = vadd.f32 %v2160_v3, %v1297_v11  ;;  %v1366_v17 = vadd.f32 %v1335_v12, %v1334_v31  ;;  %1837 = vst [vmem:[%s2762_s9] sm:$0xff] %v1836_v8   ;;  %v2118_v7 = vpop.f32.mrb[4].mxu0 }
 0x124   : > { %v2164_v15 = vadd.f32 %v2118_v7, %v2022_v50  ;;  %v1154_v42 = vpop.f32.mrb[5].mxu0 }
 0x125   : > { %v1367_v38 = vadd.f32 %v1366_v17, %v1336_v37  ;;  %v2165_v39 = vadd.f32 %v1154_v42, %v703_v2  ;;  %v1299_v40 = vadd.f32 %v2162_v21, %v1298_v60  ;;  %v2119_v43 = vpop.f32.mrb[6].mxu0 }
 0x126   : > { %v2166_v44 = vadd.f32 %v2119_v43, %v2023_v14  ;;  %v1157_v45 = vpop.f32.mrb[7].mxu0  ;;  %v1340_v34 = vmul.f32 %v2164_v15, %v2164_v15 }
 0x127   : > { %v1300_v46 = vadd.f32 %v2165_v39, %v1299_v40  ;;  %v1338_v47 = vmul.f32 %v2165_v39, %v2165_v39  ;;  %v1368_v9 = vadd.f32 %v1367_v38, %v1337_v35  ;;  %v2167_v48 = vadd.f32 %v1157_v45, %v706_v4 }
 0x128   : > { %v1851_v26 = vpack.c.bf16 %v2166_v44, %v2164_v15  ;;  %v1341_v13 = vmul.f32 %v2166_v44, %v2166_v44 }
 0x129   : > { %v1369_v32 = vadd.f32 %v1368_v9, %v1338_v47  ;;  %v1301_v36 = vadd.f32 %v2167_v48, %v1300_v46  ;;  %v1339_v33 = vmul.f32 %v2167_v48, %v2167_v48  ;;  %v1846_v23 = vpack.c.bf16 %v2167_v48, %v2165_v39 }
 0x12a   : > { %1915 = vst [vmem:[%s2762_s9 + $0x18] sm:$0xff] %v1851_v26  }
 0x12b   : > { %v1302_v51 = vadd.f32 %v2164_v15, %v1301_v36  ;;  %v1370_v57 = vadd.f32 %v1369_v32, %v1339_v33  ;;  %1914 = vst [vmem:[%s2762_s9 + $0x10] sm:$0xff] %v1846_v23   ;;  %v2122_v59 = vpop.f32.mrb[8].mxu0 }
 0x12c   : > { %v2168_v52 = vadd.f32 %v2122_v59, %v2026_v6  ;;  %v1170_v55 = vpop.f32.mrb[9].mxu0 }
 0x12d   : > { %v1371_v58 = vadd.f32 %v1370_v57, %v1340_v34  ;;  %v2169_v62 = vadd.f32 %v1170_v55, %v719_v41  ;;  %v1303_v18 = vadd.f32 %v2166_v44, %v1302_v51  ;;  %v2123_v28 = vpop.f32.mrb[10].mxu0 }
 0x12e   : > { %v2170_v63 = vadd.f32 %v2123_v28, %v2027_v53  ;;  %v1173_v22 = vpop.f32.mrb[11].mxu0  ;;  %v1344_v6 = vmul.f32 %v2168_v52, %v2168_v52 }
 0x12f   : > { %v1304_v49 = vadd.f32 %v2169_v62, %v1303_v18  ;;  %v1342_v25 = vmul.f32 %v2169_v62, %v2169_v62  ;;  %v1372_v24 = vadd.f32 %v1371_v58, %v1341_v13  ;;  %v2171_v1 = vadd.f32 %v1173_v22, %v722_v54 }
 0x130   : > { %v1861_v50 = vpack.c.bf16 %v2170_v63, %v2168_v52  ;;  %v1345_v53 = vmul.f32 %v2170_v63, %v2170_v63 }
 0x131   : > { %v1373_v2 = vadd.f32 %v1372_v24, %v1342_v25  ;;  %v1305_v14 = vadd.f32 %v2171_v1, %v1304_v49  ;;  %v1343_v4 = vmul.f32 %v2171_v1, %v2171_v1  ;;  %v1856_v0 = vpack.c.bf16 %v2171_v1, %v2169_v62 }
 0x132   : > { %1917 = vst [vmem:[%s2762_s9 + $0x28] sm:$0xff] %v1861_v50  }
 0x133   : > { %v1306_v3 = vadd.f32 %v2168_v52, %v1305_v14  ;;  %v1374_v16 = vadd.f32 %v1373_v2, %v1343_v4  ;;  %1916 = vst [vmem:[%s2762_s9 + $0x20] sm:$0xff] %v1856_v0   ;;  %v2126_v41 = vpop.f32.mrb[12].mxu0 }
 0x134   : > { %v2172_v19 = vadd.f32 %v2126_v41, %v2750_v10  ;;  %v1186_v20 = vpop.f32.mrb[13].mxu0 }
 0x135   : > { %v1375_v21 = vadd.f32 %v1374_v16, %v1344_v6  ;;  %v2173_v27 = vadd.f32 %v1186_v20, %v2752_v30  ;;  %v1307_v54 = vadd.f32 %v2170_v63, %v1306_v3  ;;  %v2127_v5 = vpop.f32.mrb[14].mxu0 }
 0x136   : > { %v2174_v29 = vadd.f32 %v2127_v5, %v2754_v56  ;;  %v1189_v31 = vpop.f32.mrb[15].mxu0  ;;  %v1348_v35 = vmul.f32 %v2172_v19, %v2172_v19 }
 0x137   : > { %v1308_v11 = vadd.f32 %v2173_v27, %v1307_v54  ;;  %v1346_v12 = vmul.f32 %v2173_v27, %v2173_v27  ;;  %v1376_v8 = vadd.f32 %v1375_v21, %v1345_v53  ;;  %v2175_v37 = vadd.f32 %v1189_v31, %v2756_v61 }
 0x138   : > { %v1871_v60 = vpack.c.bf16 %v2174_v29, %v2172_v19  ;;  %v1349_v45 = vmul.f32 %v2174_v29, %v2174_v29 }
 0x139   : > { %v1377_v17 = vadd.f32 %v1376_v8, %v1346_v12  ;;  %v1309_v10 = vadd.f32 %v2175_v37, %v1308_v11  ;;  %v1347_v7 = vmul.f32 %v2175_v37, %v2175_v37  ;;  %v1866_v15 = vpack.c.bf16 %v2175_v37, %v2173_v27 }
 0x13a   : > { %1919 = vst [vmem:[%s2762_s9 + $0x38] sm:$0xff] %v1871_v60   ;;  %v2082_v42 = vpop.f32.mrb[16].mxu1 }
 0x13b   : > { %v1310_v30 = vadd.f32 %v2172_v19, %v1309_v10  ;;  %v1378_v38 = vadd.f32 %v1377_v17, %v1347_v7  ;;  %1918 = vst [vmem:[%s2762_s9 + $0x30] sm:$0xff] %v1866_v15   ;;  %v2130_v39 = vpop.f32.mrb[16].mxu0  ;;  %v960_v56 = vpop.f32.mrb[17].mxu1 }
 0x13c   : > { %v2176_v40 = vadd.f32 %v2130_v39, %v2082_v42  ;;  %v1202_v43 = vpop.f32.mrb[17].mxu0  ;;  %v2083_v44 = vpop.f32.mrb[18].mxu1 }
 0x13d   : > { %v1379_v46 = vadd.f32 %v1378_v38, %v1348_v35  ;;  %v2177_v61 = vadd.f32 %v1202_v43, %v960_v56  ;;  %v1311_v47 = vadd.f32 %v2174_v29, %v1310_v30  ;;  %v2131_v9 = vpop.f32.mrb[18].mxu0  ;;  %v963_v48 = vpop.f32.mrb[19].mxu1 }
 0x13e   : > { %v2178_v26 = vadd.f32 %v2131_v9, %v2083_v44  ;;  %v1205_v32 = vpop.f32.mrb[19].mxu0  ;;  %v1352_v58 = vmul.f32 %v2176_v40, %v2176_v40 }
 0x13f   : > { %v1312_v36 = vadd.f32 %v2177_v61, %v1311_v47  ;;  %v1350_v33 = vmul.f32 %v2177_v61, %v2177_v61  ;;  %v1380_v23 = vadd.f32 %v1379_v46, %v1349_v45  ;;  %v2179_v34 = vadd.f32 %v1205_v32, %v963_v48 }
 0x140   : > { %v1881_v51 = vpack.c.bf16 %v2178_v26, %v2176_v40  ;;  %v1353_v24 = vmul.f32 %v2178_v26, %v2178_v26 }
 0x141   : > { %v1381_v57 = vadd.f32 %v1380_v23, %v1350_v33  ;;  %v1313_v59 = vadd.f32 %v2179_v34, %v1312_v36  ;;  %v1351_v52 = vmul.f32 %v2179_v34, %v2179_v34  ;;  %v1876_v55 = vpack.c.bf16 %v2179_v34, %v2177_v61 }
 0x142   : > { %1921 = vst [vmem:[%s2762_s9 + $0x48] sm:$0xff] %v1881_v51   ;;  %v2086_v13 = vpop.f32.mrb[20].mxu1 }
 0x143   : > { %v1314_v62 = vadd.f32 %v2176_v40, %v1313_v59  ;;  %v1382_v18 = vadd.f32 %v1381_v57, %v1351_v52  ;;  %1920 = vst [vmem:[%s2762_s9 + $0x40] sm:$0xff] %v1876_v55   ;;  %v2134_v28 = vpop.f32.mrb[20].mxu0  ;;  %v976_v63 = vpop.f32.mrb[21].mxu1 }
 0x144   : > { %v2180_v22 = vadd.f32 %v2134_v28, %v2086_v13  ;;  %v1218_v49 = vpop.f32.mrb[21].mxu0  ;;  %v2087_v25 = vpop.f32.mrb[22].mxu1 }
 0x145   : > { %v1383_v1 = vadd.f32 %v1382_v18, %v1352_v58  ;;  %v2181_v50 = vadd.f32 %v1218_v49, %v976_v63  ;;  %v1315_v2 = vadd.f32 %v2178_v26, %v1314_v62  ;;  %v2135_v14 = vpop.f32.mrb[22].mxu0  ;;  %v979_v4 = vpop.f32.mrb[23].mxu1 }
 0x146   : > { %v2182_v0 = vadd.f32 %v2135_v14, %v2087_v25  ;;  %v1221_v6 = vpop.f32.mrb[23].mxu0  ;;  %v1356_v29 = vmul.f32 %v2180_v22, %v2180_v22 }
 0x147   : > { %v1316_v3 = vadd.f32 %v2181_v50, %v1315_v2  ;;  %v1354_v16 = vmul.f32 %v2181_v50, %v2181_v50  ;;  %v1384_v41 = vadd.f32 %v1383_v1, %v1353_v24  ;;  %v2183_v19 = vadd.f32 %v1221_v6, %v979_v4 }
 0x148   : > { %v1891_v20 = vpack.c.bf16 %v2182_v0, %v2180_v22  ;;  %v1357_v10 = vmul.f32 %v2182_v0, %v2182_v0 }
 0x149   : > { %v1385_v53 = vadd.f32 %v1384_v41, %v1354_v16  ;;  %v1317_v21 = vadd.f32 %v2183_v19, %v1316_v3  ;;  %v1355_v27 = vmul.f32 %v2183_v19, %v2183_v19  ;;  %v1886_v54 = vpack.c.bf16 %v2183_v19, %v2181_v50 }
 0x14a   : > { %1923 = vst [vmem:[%s2762_s9 + $0x58] sm:$0xff] %v1891_v20   ;;  %v2090_v5 = vpop.f32.mrb[24].mxu1 }
 0x14b   : > { %v1318_v31 = vadd.f32 %v2180_v22, %v1317_v21  ;;  %v1386_v11 = vadd.f32 %v1385_v53, %v1355_v27  ;;  %1922 = vst [vmem:[%s2762_s9 + $0x50] sm:$0xff] %v1886_v54   ;;  %v2138_v12 = vpop.f32.mrb[24].mxu0  ;;  %v992_v8 = vpop.f32.mrb[25].mxu1 }
 0x14c   : > { %v2184_v37 = vadd.f32 %v2138_v12, %v2090_v5  ;;  %v1234_v60 = vpop.f32.mrb[25].mxu0  ;;  %v2091_v17 = vpop.f32.mrb[26].mxu1 }
 0x14d   : > { %v1387_v7 = vadd.f32 %v1386_v11, %v1356_v29  ;;  %v2185_v15 = vadd.f32 %v1234_v60, %v992_v8  ;;  %v1319_v42 = vadd.f32 %v2182_v0, %v1318_v31  ;;  %v2139_v35 = vpop.f32.mrb[26].mxu0  ;;  %v995_v30 = vpop.f32.mrb[27].mxu1 }
 0x14e   : > { %v2186_v38 = vadd.f32 %v2139_v35, %v2091_v17  ;;  %v1237_v39 = vpop.f32.mrb[27].mxu0  ;;  %v1360_v26 = vmul.f32 %v2184_v37, %v2184_v37 }
 0x14f   : > { %v1320_v56 = vadd.f32 %v2185_v15, %v1319_v42  ;;  %v1358_v40 = vmul.f32 %v2185_v15, %v2185_v15  ;;  %v1388_v43 = vadd.f32 %v1387_v7, %v1357_v10  ;;  %v2187_v44 = vadd.f32 %v1237_v39, %v995_v30 }
 0x150   : > { %v1901_v45 = vpack.c.bf16 %v2186_v38, %v2184_v37  ;;  %v1361_v59 = vmul.f32 %v2186_v38, %v2186_v38 }
 0x151   : > { %v1389_v46 = vadd.f32 %v1388_v43, %v1358_v40  ;;  %v1321_v61 = vadd.f32 %v2187_v44, %v1320_v56  ;;  %v1359_v47 = vmul.f32 %v2187_v44, %v2187_v44  ;;  %v1896_v9 = vpack.c.bf16 %v2187_v44, %v2185_v15 }
 0x152   : > { %1925 = vst [vmem:[%s2762_s9 + $0x68] sm:$0xff] %v1901_v45   ;;  %v2094_v48 = vpop.f32.mrb[28].mxu1 }
 0x153   : > { %v1322_v32 = vadd.f32 %v2184_v37, %v1321_v61  ;;  %v1390_v36 = vadd.f32 %v1389_v46, %v1359_v47  ;;  %1924 = vst [vmem:[%s2762_s9 + $0x60] sm:$0xff] %v1896_v9   ;;  %v2142_v33 = vpop.f32.mrb[28].mxu0  ;;  %v1008_v23 = vpop.f32.mrb[29].mxu1 }
 0x154   : > { %v2188_v34 = vadd.f32 %v2142_v33, %v2094_v48  ;;  %v1250_v51 = vpop.f32.mrb[29].mxu0  ;;  %v2095_v57 = vpop.f32.mrb[30].mxu1 }
 0x155   : > { %v1391_v52 = vadd.f32 %v1390_v36, %v1360_v26  ;;  %v2189_v55 = vadd.f32 %v1250_v51, %v1008_v23  ;;  %v1323_v13 = vadd.f32 %v2186_v38, %v1322_v32  ;;  %v2143_v58 = vpop.f32.mrb[30].mxu0  ;;  %v1011_v62 = vpop.f32.mrb[31].mxu1 }
 0x156   : > { %v2190_v18 = vadd.f32 %v2143_v58, %v2095_v57  ;;  %v1253_v28 = vpop.f32.mrb[31].mxu0  ;;  %v1364_v4 = vmul.f32 %v2188_v34, %v2188_v34 }
 0x157   : > { %v1324_v63 = vadd.f32 %v2189_v55, %v1323_v13  ;;  %v1362_v22 = vmul.f32 %v2189_v55, %v2189_v55  ;;  %v1392_v49 = vadd.f32 %v1391_v52, %v1361_v59  ;;  %v2191_v25 = vadd.f32 %v1253_v28, %v1011_v62 }
 0x158   : > { %v1911_v24 = vpack.c.bf16 %v2190_v18, %v2188_v34  ;;  %v1365_v3 = vmul.f32 %v2190_v18, %v2190_v18 }
 0x159   : > { %v1393_v1 = vadd.f32 %v1392_v49, %v1362_v22  ;;  %v1325_v50 = vadd.f32 %v2191_v25, %v1324_v63  ;;  %v1363_v2 = vmul.f32 %v2191_v25, %v2191_v25  ;;  %v1906_v14 = vpack.c.bf16 %v2191_v25, %v2189_v55 }
 0x15a   : > { %1927 = vst [vmem:[%s2762_s9 + $0x78] sm:$0xff] %v1911_v24  }
 0x15b   : > { %v1326_v0 = vadd.f32 %v2188_v34, %v1325_v50  ;;  %v1394_v6 = vadd.f32 %v1393_v1, %v1363_v2  ;;  %1926 = vst [vmem:[%s2762_s9 + $0x70] sm:$0xff] %v1906_v14  }
 0x15d   : > { %v1327_v16 = vadd.f32 %v2190_v18, %v1326_v0  ;;  %v1395_v41 = vadd.f32 %v1394_v6, %v1364_v4 }
 0x15f   : > { %v1328_v19 = vrot.slane %v1327_v16, 4  ;;  %v1396_v20 = vadd.f32 %v1395_v41, %v1365_v3 }
 0x161   : > { %v1329_v53 = vadd.f32 %v1328_v19, %v1327_v16  ;;  %v1397_v21 = vrot.slane %v1396_v20, 4 }
 0x163   : > { %v1330_v27 = vrot.slane %v1329_v53, 2  ;;  %v1398_v54 = vadd.f32 %v1397_v21, %v1396_v20 }
 0x165   : > { %v1331_v5 = vadd.f32 %v1330_v27, %v1329_v53  ;;  %v1399_v29 = vrot.slane %v1398_v54, 2 }
 0x167   : > { %v1332_v31 = vrot.slane %v1331_v5, 1  ;;  %v1400_v11 = vadd.f32 %v1399_v29, %v1398_v54 }
 0x169   : > { %v1401_v12 = vrot.slane %v1400_v11, 1  ;;  %v1333_v8 = vadd.f32 %v1332_v31, %v1331_v5 }
 0x16b   : > { %v1402_v37 = vadd.f32 %v1401_v12, %v1400_v11 }
 0x16d   : > { %v1403_v60 = vsel %vm343_vm0, %v1333_v8, %v1402_v37 }
 0x16e   : > { %1404 = vst [vmem:[%s275_s13] sm:$0x3] %v1403_v60 }
 0x16f PF: > { %s15_s17 = sadd.s32 1, %s2294_s17   ;;  %s2804_s15 = smov %s2290_s16 }
 0x170   : > { %p12_p5 = scmp.ge.s32.totalorder %s15_s17, 4   ;;  %s2805_s16 = smov %s2807_s18 }
 0x172   :  { %14 = sbr.rel (!%p12_p5) target bundleno = 2 (0x2), region = 79 }

</bundles_post_ra>
